<compile_context>
chip_gen: v5e
topology: v5e:2x2
jax: 0.10.0
libtpu: 0.0.40
codegen_flags: <defaults>
</compile_context>

<pallas_src>
import jax
import jax.numpy as jnp
from jax import lax
from jax.experimental import pallas as pl
from jax.experimental.pallas import tpu as pltpu

LANE = 128                     # fc matmul N dims padded to a full lane width
CONV_PAD = 32                  # conv Cout padding (10 / 20 real channels)
COMPUTE_DTYPE = jnp.bfloat16   # MXU-native matmul inputs; accumulation in f32
NEG_PAD = -1e30                # bias for padded fc2 logits (keeps log_softmax exact)

CONV_ROW_CAP = 2048            # pooled-row tile cap for the conv kernels
FC_ROW_CAP = 1024              # batch-row tile cap for the fused fc kernel
VMEM_LIMIT = 32 * 1024 * 1024  # explicit scoped-VMEM budget (safe v5e/v6e/v7x)


# ----------------------------------------------------------------------------
# Pallas kernels
# ----------------------------------------------------------------------------
def _conv_pool_relu_kernel(p_ref, w_ref, b_ref, o_ref):
    """Fused conv-as-matmul + 2x2 maxpool + bias + relu.

    p_ref: (4, tm, K)       patch rows; axis 0 = position in the 2x2 window
    w_ref: (K, CONV_PAD)    conv weight (Cout zero-padded)
    b_ref: (1, CONV_PAD)    conv bias  (zero-padded)
    o_ref: (tm, CONV_PAD)   pooled + relu'd activations, rows ordered (b,oh,ow)
    """
    _, tm, k = p_ref.shape
    n = w_ref.shape[1]
    # One long MXU stream: (4*tm, K) @ (K, N).  tm is always 16-aligned, so
    # the leading-dim collapse / split reshapes are free (no sublane repack).
    p = p_ref[...].reshape(4 * tm, k)
    z = jnp.dot(p, w_ref[...], preferred_element_type=jnp.float32)
    z = z.reshape(4, tm, n)
    z = jnp.maximum(jnp.maximum(z[0], z[1]), jnp.maximum(z[2], z[3]))
    z = z + b_ref[...]
    o_ref[...] = jnp.maximum(z, 0.0).astype(o_ref.dtype)


def _fc_fused_kernel(x_ref, w1_ref, b1_ref, w2_ref, b2_ref, o_ref):
    """fc1 + relu (+ eval-mode dropout == identity) + fc2 + log_softmax."""
    h = jnp.dot(x_ref[...], w1_ref[...], preferred_element_type=jnp.float32)
    h = jnp.maximum(h + b1_ref[...], 0.0)
    # TODO(synk): training-mode F.dropout (stochastic) not implemented; eval = identity.
    z = jnp.dot(h.astype(w2_ref.dtype), w2_ref[...],
                preferred_element_type=jnp.float32)
    z = z + b2_ref[...]                       # padded columns carry a -1e30 bias
    m = jnp.max(z, axis=-1, keepdims=True)
    e = jnp.exp(z - m)
    lse = jnp.log(jnp.sum(e, axis=-1, keepdims=True)) + m
    o_ref[...] = (z - lse).astype(o_ref.dtype)


# ----------------------------------------------------------------------------
# Pallas wrappers
# ----------------------------------------------------------------------------
def _row_tile(m, cap):
    """Fixed 16-aligned row tile; grid = cdiv(m, tile) handles ragged tails.

    Small arrays get one full block; larger ones are split into >= 2 blocks so
    the 'parallel' grid axis can shard across v7x's two TensorCores.
    """
    if m > cap:
        return cap
    if m <= 128:
        return m
    return min(m, (((m + 1) // 2) + 15) // 16 * 16)


def conv_pool_relu(patches_grouped, w, b):
    """patches_grouped: (4, m_pool, K) bf16 -> (m_pool, CONV_PAD) bf16."""
    _, m, K = patches_grouped.shape
    N = w.shape[1]
    tm = _row_tile(m, CONV_ROW_CAP)
    grid = (pl.cdiv(m, tm),)
    cost = pl.CostEstimate(
        flops=int(2 * 4 * m * K * N + 5 * m * N),
        transcendentals=0,
        bytes_accessed=int(patches_grouped.size * 2 + w.size * 2
                           + b.size * 4 + m * N * 2))
    return pl.pallas_call(
        _conv_pool_relu_kernel,
        out_shape=jax.ShapeDtypeStruct((m, N), COMPUTE_DTYPE),
        grid=grid,
        in_specs=[
            pl.BlockSpec((4, tm, K), lambda i: (0, i, 0)),
            pl.BlockSpec((K, N), lambda i: (0, 0)),
            pl.BlockSpec((1, N), lambda i: (0, 0)),
        ],
        out_specs=pl.BlockSpec((tm, N), lambda i: (i, 0)),
        compiler_params=pltpu.CompilerParams(
            dimension_semantics=("parallel",),
            vmem_limit_bytes=VMEM_LIMIT),
        cost_estimate=cost,
    )(patches_grouped, w, b)


def fc_fused(x, w1, b1, w2, b2):
    """x: (B, 512) bf16 -> (B, 128) f32 log-probs (first 10 columns real)."""
    B, K1 = x.shape
    N1 = w1.shape[1]
    N2 = w2.shape[1]
    bt = _row_tile(B, FC_ROW_CAP)
    grid = (pl.cdiv(B, bt),)
    cost = pl.CostEstimate(
        flops=int(2 * B * K1 * N1 + 2 * B * N1 * N2 + 8 * B * N2),
        transcendentals=int(B * N2 + B),
        bytes_accessed=int(x.size * 2 + w1.size * 2 + w2.size * 2
                           + (N1 + N2) * 4 + B * N2 * 4))
    return pl.pallas_call(
        _fc_fused_kernel,
        out_shape=jax.ShapeDtypeStruct((B, N2), jnp.float32),
        grid=grid,
        in_specs=[
            pl.BlockSpec((bt, K1), lambda i: (i, 0)),
            pl.BlockSpec((K1, N1), lambda i: (0, 0)),
            pl.BlockSpec((1, N1), lambda i: (0, 0)),
            pl.BlockSpec((N1, N2), lambda i: (0, 0)),
            pl.BlockSpec((1, N2), lambda i: (0, 0)),
        ],
        out_specs=pl.BlockSpec((bt, N2), lambda i: (i, 0)),
        compiler_params=pltpu.CompilerParams(
            dimension_semantics=("parallel",),
            vmem_limit_bytes=VMEM_LIMIT),
        cost_estimate=cost,
    )(x, w1, b1, w2, b2)


# ----------------------------------------------------------------------------
# Plain-JAX glue: one patch-extraction op + pool-window regrouping
# ----------------------------------------------------------------------------
def _extract_pool_grouped_patches(x, k, dimension_numbers):
    """Extract kxk patches (feature order cin-major then row-major (di,dj),
    matching PyTorch weight.reshape(Cout, Cin*k*k)), then regroup so the 4
    members of each 2x2 pool window become the leading axis."""
    patches = lax.conv_general_dilated_patches(
        x, (k, k), (1, 1), 'VALID', dimension_numbers=dimension_numbers)
    B, Ho, Wo, K = patches.shape
    assert Ho % 2 == 0 and Wo % 2 == 0, "maxpool(2) needs even spatial dims"
    p = patches.reshape(B, Ho // 2, 2, Wo // 2, 2, K)
    p = p.transpose(2, 4, 0, 1, 3, 5)                  # (2, 2, B, Ho/2, Wo/2, K)
    return p.reshape(4, B * (Ho // 2) * (Wo // 2), K), Ho // 2, Wo // 2


# ----------------------------------------------------------------------------
# Parameters (PyTorch layouts -> padded kernel layouts)
# ----------------------------------------------------------------------------
def init_torch_params(key):
    """Random init with the exact shapes/layouts of the PyTorch module."""
    ks = jax.random.split(key, 8)

    def uinit(k, shape, fan_in):
        bound = 1.0 / (fan_in ** 0.5)
        return jax.random.uniform(k, shape, jnp.float32, -bound, bound)

    return dict(
        conv1_w=uinit(ks[0], (10, 1, 5, 5), 25),
        conv1_b=uinit(ks[1], (10,), 25),
        conv2_w=uinit(ks[2], (20, 10, 5, 5), 250),
        conv2_b=uinit(ks[3], (20,), 250),
        fc1_w=uinit(ks[4], (50, 320), 320),
        fc1_b=uinit(ks[5], (50,), 320),
        fc2_w=uinit(ks[6], (10, 50), 50),
        fc2_b=uinit(ks[7], (10,), 50),
    )


def prepare_params(tp):
    """Convert PyTorch-layout params to padded, NHWC-consistent kernel layouts."""
    def pad_cols(mat, n):  # (K, c) -> (K, n)
        return jnp.pad(mat, ((0, 0), (0, n - mat.shape[1])))

    w1 = pad_cols(tp['conv1_w'].reshape(10, 25).T, CONV_PAD).astype(COMPUTE_DTYPE)   # (25, 32)
    b1 = jnp.pad(tp['conv1_b'], (0, CONV_PAD - 10)).reshape(1, CONV_PAD)
    w2 = pad_cols(tp['conv2_w'].reshape(20, 250).T, CONV_PAD).astype(COMPUTE_DTYPE)  # (250, 32)
    b2 = jnp.pad(tp['conv2_b'], (0, CONV_PAD - 20)).reshape(1, CONV_PAD)

    # fc1 consumes the conv2+pool output laid out as (B, 16*32) with feature
    # index s*32 + c (s = spatial oh*4+ow, c = channel).  PyTorch's NCHW
    # flatten uses column c*16 + s of fc1_w, so re-index the weight once here.
    f1 = tp['fc1_w'].reshape(50, 20, 16).transpose(2, 1, 0)                # (16, 20, 50)
    wf1 = jnp.zeros((16, CONV_PAD, LANE), jnp.float32).at[:, :20, :50].set(f1)
    wf1 = wf1.reshape(16 * CONV_PAD, LANE).astype(COMPUTE_DTYPE)           # (512, 128)
    bf1 = jnp.pad(tp['fc1_b'], (0, LANE - 50)).reshape(1, LANE)

    wf2 = jnp.zeros((LANE, LANE), jnp.float32).at[:50, :10].set(tp['fc2_w'].T)
    wf2 = wf2.astype(COMPUTE_DTYPE)                                        # (128, 128)
    bf2 = jnp.full((1, LANE), NEG_PAD, jnp.float32).at[0, :10].set(tp['fc2_b'])

    return dict(w1=w1, b1=b1.astype(jnp.float32),
                w2=w2, b2=b2.astype(jnp.float32),
                wf1=wf1, bf1=bf1.astype(jnp.float32),
                wf2=wf2, bf2=bf2)


# ----------------------------------------------------------------------------
# Forward pass (3 Pallas kernels)
# ----------------------------------------------------------------------------
@jax.jit
def dnn_forward(x, params):
    B = x.shape[0]

    # conv1 (1->10, k=5) + maxpool2 + relu      [one fused Pallas kernel]
    p1, h1h, h1w = _extract_pool_grouped_patches(
        x.astype(COMPUTE_DTYPE), 5, ('NCHW', 'OIHW', 'NHWC'))
    a1 = conv_pool_relu(p1, params['w1'], params['b1'])       # (B*144, 32)
    h1 = a1.reshape(B, h1h, h1w, CONV_PAD)[..., :10]          # NHWC (B, 12, 12, 10)

    # conv2 (10->20, k=5) + Dropout2d(eval=id) + maxpool2 + relu   [one kernel]
    p2, h2h, h2w = _extract_pool_grouped_patches(h1, 5, ('NHWC', 'HWIO', 'NHWC'))
    a2 = conv_pool_relu(p2, params['w2'], params['b2'])       # (B*16, 32)

    # fc1 + relu + dropout(eval=id) + fc2 + log_softmax        [one fused kernel]
    feat = a2.reshape(B, h2h * h2w * CONV_PAD)                # (B, 512)
    logp = fc_fused(feat, params['wf1'], params['bf1'],
                    params['wf2'], params['bf2'])             # (B, 128)
    return logp[:, :10]


# ----------------------------------------------------------------------------
# Pure-JAX f32 reference (mirrors the PyTorch module) for verification
# ----------------------------------------------------------------------------
def reference_forward(x, tp):
    dn = ('NCHW', 'OIHW', 'NCHW')

    def pool_relu(t):
        p = lax.reduce_window(t, -jnp.inf, lax.max,
                              (1, 1, 2, 2), (1, 1, 2, 2), 'VALID')
        return jnp.maximum(p, 0.0)

    c1 = lax.conv_general_dilated(x, tp['conv1_w'], (1, 1), 'VALID',
                                  dimension_numbers=dn)
    h1 = pool_relu(c1 + tp['conv1_b'][None, :, None, None])
    c2 = lax.conv_general_dilated(h1, tp['conv2_w'], (1, 1), 'VALID',
                                  dimension_numbers=dn)
    h2 = pool_relu(c2 + tp['conv2_b'][None, :, None, None])
    flat = h2.reshape(h2.shape[0], -1)                         # NCHW flatten -> 320
    f1 = jnp.maximum(flat @ tp['fc1_w'].T + tp['fc1_b'], 0.0)
    z = f1 @ tp['fc2_w'].T + tp['fc2_b']
    return jax.nn.log_softmax(z, axis=-1)


if __name__ == "__main__":
    key = jax.random.PRNGKey(0)
    pkey, xkey = jax.random.split(key)
    torch_params = init_torch_params(pkey)
    params = prepare_params(torch_params)

    # MNIST-shaped input so the flatten to 320 works: (B, 1, 28, 28)
    x = jax.random.normal(xkey, (2, 1, 28, 28), dtype=jnp.float32)

    out = dnn_forward(x, params)
    jax.block_until_ready(out)

    assert out.shape == (2, 10)
    # log_softmax rows must exponentiate-sum to 1
    assert jnp.allclose(jnp.sum(jnp.exp(out), axis=-1), 1.0, atol=1e-3)
    # match the PyTorch-equivalent f32 reference (bf16 matmul inputs -> loose tol)
    ref = reference_forward(x, torch_params)
    max_err = float(jnp.max(jnp.abs(out - ref)))
    assert max_err < 0.1, f"mismatch vs reference: {max_err}"
    print("KERNEL_OK")
</pallas_src>

<mosaic_0001>
module attributes {stable_mosaic.version = 11 : i64} {
  func.func @_conv_pool_relu_kernel(%arg0: i32, %arg1: memref<4x144x25xbf16, #tpu.memory_space<vmem>>, %arg2: memref<25x32xbf16, #tpu.memory_space<vmem>>, %arg3: memref<1x32xf32, #tpu.memory_space<vmem>>, %arg4: memref<144x32xbf16, #tpu.memory_space<vmem>>) attributes {dimension_semantics = [#tpu.dimension_semantics<parallel>], iteration_bounds = array<i64: 2>, scalar_prefetch = 0 : i64, scratch_operands = 0 : i64, tpu.core_type = #tpu.core_type<tc>, window_params = [{transform_indices = @transform_0, window_bounds = array<i64: 4, 144, 25>}, {pipeline_mode = #tpu.pipeline_mode<synchronous>, transform_indices = @transform_1, window_bounds = array<i64: 25, 32>}, {pipeline_mode = #tpu.pipeline_mode<synchronous>, transform_indices = @transform_2, window_bounds = array<i64: 1, 32>}, {transform_indices = @transform_3, window_bounds = array<i64: 144, 32>}]} {
    %c0 = arith.constant 0 : index
    %c0_0 = arith.constant 0 : index
    %c0_1 = arith.constant 0 : index
    %0 = vector.load %arg1[%c0, %c0_0, %c0_1] : memref<4x144x25xbf16, #tpu.memory_space<vmem>>, vector<4x144x25xbf16>
    %1 = vector.shape_cast %0 : vector<4x144x25xbf16> to vector<576x25xbf16>
    %c0_2 = arith.constant 0 : index
    %c0_3 = arith.constant 0 : index
    %2 = vector.load %arg2[%c0_2, %c0_3] : memref<25x32xbf16, #tpu.memory_space<vmem>>, vector<25x32xbf16>
    %cst = arith.constant dense<0.000000e+00> : vector<576x32xf32>
    %3 = tpu.matmul %1, %2, %cst {dimension_numbers = #tpu.dot_dimension_numbers<[1], [0], [0], [1], [0, 0, 1, 1], [], []>} : vector<576x25xbf16>, vector<25x32xbf16>, vector<576x32xf32> -> vector<576x32xf32>
    %4 = vector.shape_cast %3 : vector<576x32xf32> to vector<4x144x32xf32>
    %5 = vector.extract_strided_slice %4 {offsets = [0, 0, 0], sizes = [1, 144, 32], strides = [1, 1, 1]} : vector<4x144x32xf32> to vector<1x144x32xf32>
    %6 = vector.shape_cast %5 : vector<1x144x32xf32> to vector<144x32xf32>
    %7 = vector.extract_strided_slice %4 {offsets = [1, 0, 0], sizes = [1, 144, 32], strides = [1, 1, 1]} : vector<4x144x32xf32> to vector<1x144x32xf32>
    %8 = vector.shape_cast %7 : vector<1x144x32xf32> to vector<144x32xf32>
    %9 = arith.maximumf %6, %8 : vector<144x32xf32>
    %10 = vector.extract_strided_slice %4 {offsets = [2, 0, 0], sizes = [1, 144, 32], strides = [1, 1, 1]} : vector<4x144x32xf32> to vector<1x144x32xf32>
    %11 = vector.shape_cast %10 : vector<1x144x32xf32> to vector<144x32xf32>
    %12 = vector.extract_strided_slice %4 {offsets = [3, 0, 0], sizes = [1, 144, 32], strides = [1, 1, 1]} : vector<4x144x32xf32> to vector<1x144x32xf32>
    %13 = vector.shape_cast %12 : vector<1x144x32xf32> to vector<144x32xf32>
    %14 = arith.maximumf %11, %13 : vector<144x32xf32>
    %15 = arith.maximumf %9, %14 : vector<144x32xf32>
    %c0_4 = arith.constant 0 : index
    %c0_5 = arith.constant 0 : index
    %16 = vector.load %arg3[%c0_4, %c0_5] : memref<1x32xf32, #tpu.memory_space<vmem>>, vector<1x32xf32>
    %17 = vector.broadcast %16 : vector<1x32xf32> to vector<144x32xf32>
    %18 = arith.addf %15, %17 : vector<144x32xf32>
    %cst_6 = arith.constant 0.000000e+00 : f32
    %19 = vector.broadcast %cst_6 : f32 to vector<144x32xf32>
    %20 = arith.maximumf %18, %19 : vector<144x32xf32>
    %21 = arith.truncf %20 : vector<144x32xf32> to vector<144x32xbf16>
    %c0_7 = arith.constant 0 : index
    %c0_8 = arith.constant 0 : index
    %22 = vector.load %arg4[%c0_7, %c0_8] : memref<144x32xbf16, #tpu.memory_space<vmem>>, vector<144x32xbf16>
    tpu.vector_store %arg4[%c0_7, %c0_8], %21 {strides = array<i32>} : memref<144x32xbf16, #tpu.memory_space<vmem>>, vector<144x32xbf16>,
    return
  }
  func.func @transform_0(%arg0: i32) -> (i32, i32, i32) {
    %c0_i32 = arith.constant 0 : i32
    %c0_i32_0 = arith.constant 0 : i32
    %c0_i32_1 = arith.constant 0 : i32
    return %c0_i32, %arg0, %c0_i32_0 : i32, i32, i32
  }
  func.func @transform_1(%arg0: i32) -> (i32, i32) {
    %c0_i32 = arith.constant 0 : i32
    %c0_i32_0 = arith.constant 0 : i32
    %c0_i32_1 = arith.constant 0 : i32
    return %c0_i32, %c0_i32_0 : i32, i32
  }
  func.func @transform_2(%arg0: i32) -> (i32, i32) {
    %c0_i32 = arith.constant 0 : i32
    %c0_i32_0 = arith.constant 0 : i32
    %c0_i32_1 = arith.constant 0 : i32
    return %c0_i32, %c0_i32_0 : i32, i32
  }
  func.func @transform_3(%arg0: i32) -> (i32, i32) {
    %c0_i32 = arith.constant 0 : i32
    %c0_i32_0 = arith.constant 0 : i32
    return %arg0, %c0_i32 : i32, i32
  }
}

module attributes {stable_mosaic.version = 11 : i64} {
  func.func @_conv_pool_relu_kernel(%arg0: i32, %arg1: memref<4x32x250xbf16, #tpu.memory_space<vmem>>, %arg2: memref<250x32xbf16, #tpu.memory_space<vmem>>, %arg3: memref<1x32xf32, #tpu.memory_space<vmem>>, %arg4: memref<32x32xbf16, #tpu.memory_space<vmem>>) attributes {dimension_semantics = [#tpu.dimension_semantics<parallel>], iteration_bounds = array<i64: 1>, scalar_prefetch = 0 : i64, scratch_operands = 0 : i64, tpu.core_type = #tpu.core_type<tc>, window_params = [{transform_indices = @transform_0, window_bounds = array<i64: 4, 32, 250>}, {pipeline_mode = #tpu.pipeline_mode<synchronous>, transform_indices = @transform_1, window_bounds = array<i64: 250, 32>}, {pipeline_mode = #tpu.pipeline_mode<synchronous>, transform_indices = @transform_2, window_bounds = array<i64: 1, 32>}, {transform_indices = @transform_3, window_bounds = array<i64: 32, 32>}]} {
    %c0 = arith.constant 0 : index
    %c0_0 = arith.constant 0 : index
    %c0_1 = arith.constant 0 : index
    %0 = vector.load %arg1[%c0, %c0_0, %c0_1] : memref<4x32x250xbf16, #tpu.memory_space<vmem>>, vector<4x32x250xbf16>
    %1 = vector.shape_cast %0 : vector<4x32x250xbf16> to vector<128x250xbf16>
    %c0_2 = arith.constant 0 : index
    %c0_3 = arith.constant 0 : index
    %2 = vector.load %arg2[%c0_2, %c0_3] : memref<250x32xbf16, #tpu.memory_space<vmem>>, vector<250x32xbf16>
    %cst = arith.constant dense<0.000000e+00> : vector<128x32xf32>
    %3 = tpu.matmul %1, %2, %cst {dimension_numbers = #tpu.dot_dimension_numbers<[1], [0], [0], [1], [0, 0, 1, 1], [], []>} : vector<128x250xbf16>, vector<250x32xbf16>, vector<128x32xf32> -> vector<128x32xf32>
    %4 = vector.shape_cast %3 : vector<128x32xf32> to vector<4x32x32xf32>
    %5 = vector.extract_strided_slice %4 {offsets = [0, 0, 0], sizes = [1, 32, 32], strides = [1, 1, 1]} : vector<4x32x32xf32> to vector<1x32x32xf32>
    %6 = vector.shape_cast %5 : vector<1x32x32xf32> to vector<32x32xf32>
    %7 = vector.extract_strided_slice %4 {offsets = [1, 0, 0], sizes = [1, 32, 32], strides = [1, 1, 1]} : vector<4x32x32xf32> to vector<1x32x32xf32>
    %8 = vector.shape_cast %7 : vector<1x32x32xf32> to vector<32x32xf32>
    %9 = arith.maximumf %6, %8 : vector<32x32xf32>
    %10 = vector.extract_strided_slice %4 {offsets = [2, 0, 0], sizes = [1, 32, 32], strides = [1, 1, 1]} : vector<4x32x32xf32> to vector<1x32x32xf32>
    %11 = vector.shape_cast %10 : vector<1x32x32xf32> to vector<32x32xf32>
    %12 = vector.extract_strided_slice %4 {offsets = [3, 0, 0], sizes = [1, 32, 32], strides = [1, 1, 1]} : vector<4x32x32xf32> to vector<1x32x32xf32>
    %13 = vector.shape_cast %12 : vector<1x32x32xf32> to vector<32x32xf32>
    %14 = arith.maximumf %11, %13 : vector<32x32xf32>
    %15 = arith.maximumf %9, %14 : vector<32x32xf32>
    %c0_4 = arith.constant 0 : index
    %c0_5 = arith.constant 0 : index
    %16 = vector.load %arg3[%c0_4, %c0_5] : memref<1x32xf32, #tpu.memory_space<vmem>>, vector<1x32xf32>
    %17 = vector.broadcast %16 : vector<1x32xf32> to vector<32x32xf32>
    %18 = arith.addf %15, %17 : vector<32x32xf32>
    %cst_6 = arith.constant 0.000000e+00 : f32
    %19 = vector.broadcast %cst_6 : f32 to vector<32x32xf32>
    %20 = arith.maximumf %18, %19 : vector<32x32xf32>
    %21 = arith.truncf %20 : vector<32x32xf32> to vector<32x32xbf16>
    %c0_7 = arith.constant 0 : index
    %c0_8 = arith.constant 0 : index
    %22 = vector.load %arg4[%c0_7, %c0_8] : memref<32x32xbf16, #tpu.memory_space<vmem>>, vector<32x32xbf16>
    tpu.vector_store %arg4[%c0_7, %c0_8], %21 {strides = array<i32>} : memref<32x32xbf16, #tpu.memory_space<vmem>>, vector<32x32xbf16>,
    return
  }
  func.func @transform_0(%arg0: i32) -> (i32, i32, i32) {
    %c0_i32 = arith.constant 0 : i32
    %c0_i32_0 = arith.constant 0 : i32
    %c0_i32_1 = arith.constant 0 : i32
    return %c0_i32, %arg0, %c0_i32_0 : i32, i32, i32
  }
  func.func @transform_1(%arg0: i32) -> (i32, i32) {
    %c0_i32 = arith.constant 0 : i32
    %c0_i32_0 = arith.constant 0 : i32
    %c0_i32_1 = arith.constant 0 : i32
    return %c0_i32, %c0_i32_0 : i32, i32
  }
  func.func @transform_2(%arg0: i32) -> (i32, i32) {
    %c0_i32 = arith.constant 0 : i32
    %c0_i32_0 = arith.constant 0 : i32
    %c0_i32_1 = arith.constant 0 : i32
    return %c0_i32, %c0_i32_0 : i32, i32
  }
  func.func @transform_3(%arg0: i32) -> (i32, i32) {
    %c0_i32 = arith.constant 0 : i32
    %c0_i32_0 = arith.constant 0 : i32
    return %arg0, %c0_i32 : i32, i32
  }
}

module attributes {stable_mosaic.version = 11 : i64} {
  func.func @_fc_fused_kernel(%arg0: i32, %arg1: memref<2x512xbf16, #tpu.memory_space<vmem>>, %arg2: memref<512x128xbf16, #tpu.memory_space<vmem>>, %arg3: memref<1x128xf32, #tpu.memory_space<vmem>>, %arg4: memref<128x128xbf16, #tpu.memory_space<vmem>>, %arg5: memref<1x128xf32, #tpu.memory_space<vmem>>, %arg6: memref<2x128xf32, #tpu.memory_space<vmem>>) attributes {dimension_semantics = [#tpu.dimension_semantics<parallel>], iteration_bounds = array<i64: 1>, scalar_prefetch = 0 : i64, scratch_operands = 0 : i64, tpu.core_type = #tpu.core_type<tc>, window_params = [{transform_indices = @transform_0, window_bounds = array<i64: 2, 512>}, {pipeline_mode = #tpu.pipeline_mode<synchronous>, transform_indices = @transform_1, window_bounds = array<i64: 512, 128>}, {pipeline_mode = #tpu.pipeline_mode<synchronous>, transform_indices = @transform_2, window_bounds = array<i64: 1, 128>}, {pipeline_mode = #tpu.pipeline_mode<synchronous>, transform_indices = @transform_3, window_bounds = array<i64: 128, 128>}, {pipeline_mode = #tpu.pipeline_mode<synchronous>, transform_indices = @transform_4, window_bounds = array<i64: 1, 128>}, {transform_indices = @transform_5, window_bounds = array<i64: 2, 128>}]} {
    %c0 = arith.constant 0 : index
    %c0_0 = arith.constant 0 : index
    %0 = vector.load %arg1[%c0, %c0_0] : memref<2x512xbf16, #tpu.memory_space<vmem>>, vector<2x512xbf16>
    %c0_1 = arith.constant 0 : index
    %c0_2 = arith.constant 0 : index
    %1 = vector.load %arg2[%c0_1, %c0_2] : memref<512x128xbf16, #tpu.memory_space<vmem>>, vector<512x128xbf16>
    %cst = arith.constant dense<0.000000e+00> : vector<2x128xf32>
    %2 = tpu.matmul %0, %1, %cst {dimension_numbers = #tpu.dot_dimension_numbers<[1], [0], [0], [1], [0, 0, 1, 1], [], []>} : vector<2x512xbf16>, vector<512x128xbf16>, vector<2x128xf32> -> vector<2x128xf32>
    %c0_3 = arith.constant 0 : index
    %c0_4 = arith.constant 0 : index
    %3 = vector.load %arg3[%c0_3, %c0_4] : memref<1x128xf32, #tpu.memory_space<vmem>>, vector<1x128xf32>
    %4 = vector.broadcast %3 : vector<1x128xf32> to vector<2x128xf32>
    %5 = arith.addf %2, %4 : vector<2x128xf32>
    %cst_5 = arith.constant 0.000000e+00 : f32
    %6 = vector.broadcast %cst_5 : f32 to vector<2x128xf32>
    %7 = arith.maximumf %5, %6 : vector<2x128xf32>
    %8 = arith.truncf %7 : vector<2x128xf32> to vector<2x128xbf16>
    %c0_6 = arith.constant 0 : index
    %c0_7 = arith.constant 0 : index
    %9 = vector.load %arg4[%c0_6, %c0_7] : memref<128x128xbf16, #tpu.memory_space<vmem>>, vector<128x128xbf16>
    %cst_8 = arith.constant dense<0.000000e+00> : vector<2x128xf32>
    %10 = tpu.matmul %8, %9, %cst_8 {dimension_numbers = #tpu.dot_dimension_numbers<[1], [0], [0], [1], [0, 0, 1, 1], [], []>} : vector<2x128xbf16>, vector<128x128xbf16>, vector<2x128xf32> -> vector<2x128xf32>
    %c0_9 = arith.constant 0 : index
    %c0_10 = arith.constant 0 : index
    %11 = vector.load %arg5[%c0_9, %c0_10] : memref<1x128xf32, #tpu.memory_space<vmem>>, vector<1x128xf32>
    %12 = vector.broadcast %11 : vector<1x128xf32> to vector<2x128xf32>
    %13 = arith.addf %10, %12 : vector<2x128xf32>
    %cst_11 = arith.constant dense<0xFF800000> : vector<2xf32>
    %14 = vector.multi_reduction <maximumf>, %13, %cst_11 [1] : vector<2x128xf32> to vector<2xf32>
    %15 = vector.shape_cast %14 : vector<2xf32> to vector<2x1xf32>
    %16 = vector.broadcast %15 : vector<2x1xf32> to vector<2x128xf32>
    %17 = arith.subf %13, %16 : vector<2x128xf32>
    %18 = math.exp %17 : vector<2x128xf32>
    %cst_12 = arith.constant dense<0.000000e+00> : vector<2xf32>
    %19 = vector.multi_reduction <add>, %18, %cst_12 [1] : vector<2x128xf32> to vector<2xf32>
    %20 = vector.shape_cast %19 : vector<2xf32> to vector<2x1xf32>
    %21 = math.log %20 : vector<2x1xf32>
    %22 = arith.addf %21, %15 : vector<2x1xf32>
    %23 = vector.broadcast %22 : vector<2x1xf32> to vector<2x128xf32>
    %24 = arith.subf %13, %23 : vector<2x128xf32>
    %c0_13 = arith.constant 0 : index
    %c0_14 = arith.constant 0 : index
    %25 = vector.load %arg6[%c0_13, %c0_14] : memref<2x128xf32, #tpu.memory_space<vmem>>, vector<2x128xf32>
    tpu.vector_store %arg6[%c0_13, %c0_14], %24 {strides = array<i32>} : memref<2x128xf32, #tpu.memory_space<vmem>>, vector<2x128xf32>,
    return
  }
  func.func @transform_0(%arg0: i32) -> (i32, i32) {
    %c0_i32 = arith.constant 0 : i32
    %c0_i32_0 = arith.constant 0 : i32
    return %arg0, %c0_i32 : i32, i32
  }
  func.func @transform_1(%arg0: i32) -> (i32, i32) {
    %c0_i32 = arith.constant 0 : i32
    %c0_i32_0 = arith.constant 0 : i32
    %c0_i32_1 = arith.constant 0 : i32
    return %c0_i32, %c0_i32_0 : i32, i32
  }
  func.func @transform_2(%arg0: i32) -> (i32, i32) {
    %c0_i32 = arith.constant 0 : i32
    %c0_i32_0 = arith.constant 0 : i32
    %c0_i32_1 = arith.constant 0 : i32
    return %c0_i32, %c0_i32_0 : i32, i32
  }
  func.func @transform_3(%arg0: i32) -> (i32, i32) {
    %c0_i32 = arith.constant 0 : i32
    %c0_i32_0 = arith.constant 0 : i32
    %c0_i32_1 = arith.constant 0 : i32
    return %c0_i32, %c0_i32_0 : i32, i32
  }
  func.func @transform_4(%arg0: i32) -> (i32, i32) {
    %c0_i32 = arith.constant 0 : i32
    %c0_i32_0 = arith.constant 0 : i32
    %c0_i32_1 = arith.constant 0 : i32
    return %c0_i32, %c0_i32_0 : i32, i32
  }
  func.func @transform_5(%arg0: i32) -> (i32, i32) {
    %c0_i32 = arith.constant 0 : i32
    %c0_i32_0 = arith.constant 0 : i32
    return %arg0, %c0_i32 : i32, i32
  }
}

</mosaic_0001>

<bundles_post_ra>
// kernel: dnn_forward.3
= control target key start
LH: loop header
LB: loop body
LE: loop exit
PB: predicated region body
PF: predicated region fallthrough
CT: control target
= control target key end

     0   :  { %s1582_s12 = smov 0   ;;  %s1584_s13 = smov 0   ;;  %s1854_s0 = inlined_call_operand.vmem [shape: bf16[4,288,25], index: 0, kind: input, shape index: {}]   ;;  %s1855_s1 = inlined_call_operand.vmem [shape: bf16[25,32], index: 1, kind: input, shape index: {}]   ;;  %s1856_s2 = inlined_call_operand.vmem [shape: f32[1,32], index: 2, kind: input, shape index: {}]   ;;  %s1857_s3 = inlined_call_operand.vmem [shape: bf16[288,32], index: 3, kind: output, shape index: {}]  }
   0x1   :  { %s1586_s14 = smov 0  }
   0x2 LB: > { %s1267_s15 = sadd.s32 4294967295, %s1559_s14   ;;  %s1599_s16 = sadd.s32 1, %s1559_s14   ;;  %s1559_s14 = sphi %s1586_s14, %s1860_s14   ;;  %s1555_s13 = sphi %s1584_s13, %s1859_s13   ;;  %s1551_s12 = sphi %s1582_s12, %s1858_s12  }
   0x3   : > { %s17_s17 = ssub.s32 %s1559_s14, %s1599_s16  ;;  %s20_s18 = sadd.s32 1, %s1555_s13 }
   0x4   : > { %p18_p0 = scmp.eq.s32.totalorder %s17_s17, 0  ;;  %p27_p1 = scmp.ne.s32.totalorder %s1555_s13, %s1551_s12 }
   0x5   : > { %p28_p2 = scmp.eq.s32.totalorder %s1559_s14, 0  ;;  %p1270_p4 = scmp.ge.s32.totalorder %s1559_s14, 2 }
   0x6   : > { %s1608_s19 = scalar_select %p18_p0, %s1555_s13, %s20_s18  }
   0x7   : > { %p29_p3 = por %p28_p2, %p27_p1  ;;  %127 = sbr.rel (%p1270_p4) target bundleno = 53 (0x35), region = 24 }
   0xc   : > { %130 = sbr.rel (!%p29_p3) target bundleno = 53 (0x35), region = 28  ;;  %s132_s20 = sand.u32 (%p29_p3), 1, %s1555_s13  }
   0xd   : > { %s1464_s21 = smul.u32 (%p29_p3), 72, %s1559_s14 }
   0xe   : > { %s1509_s22 = smul.u32 (%p29_p3), 288, %s132_s20 }
   0xf   : > { %s1616_s25 = scalar_lea.vmem (%p29_p3), %s1854_s0, %s1464_s21 }
  0x10   : > { %v154_v0 = vld [vmem:[%s1616_s25] sm:$0xff] (%p29_p3)   ;;  %v158_v1 = vld [vmem:[%s1616_s25 + $0x8] sm:$0xff] (%p29_p3)   ;;  %v162_v2 = vld [vmem:[%s1616_s25 + $0x10] sm:$0xff] (%p29_p3)   ;;  %s1621_s26 = scalar_lea.vmem (%p29_p3), [#allocation2], %s1509_s22 }
  0x11   : > { %155 = vst [vmem:[%s1621_s26] sm:$0xff] %v154_v0   ;;  %v166_v3 = vld [vmem:[%s1616_s25 + $0x18] sm:$0xff]   ;;  %v170_v4 = vld [vmem:[%s1616_s25 + $0x20] sm:$0xff]   ;;  %v174_v5 = vld [vmem:[%s1616_s25 + $0x28] sm:$0xff]  }
  0x12   : > { %159 = vst [vmem:[%s1621_s26 + $0x8] sm:$0xff] %v158_v1   ;;  %v178_v6 = vld [vmem:[%s1616_s25 + $0x30] sm:$0xff]   ;;  %v182_v7 = vld [vmem:[%s1616_s25 + $0x38] sm:$0xff]   ;;  %v186_v8 = vld [vmem:[%s1616_s25 + $0x40] sm:$0xff]  }
  0x13   : > { %163 = vst [vmem:[%s1621_s26 + $0x10] sm:$0xff] %v162_v2   ;;  %v190_v9 = vld [vmem:[%s1616_s25 + $0x90] sm:$0xff]   ;;  %v194_v10 = vld [vmem:[%s1616_s25 + $0x98] sm:$0xff]   ;;  %v198_v11 = vld [vmem:[%s1616_s25 + $0xa0] sm:$0xff]  }
  0x14   : > { %167 = vst [vmem:[%s1621_s26 + $0x18] sm:$0xff] %v166_v3   ;;  %v202_v12 = vld [vmem:[%s1616_s25 + $0xa8] sm:$0xff]   ;;  %v206_v13 = vld [vmem:[%s1616_s25 + $0xb0] sm:$0xff]   ;;  %v210_v14 = vld [vmem:[%s1616_s25 + $0xb8] sm:$0xff]  }
  0x15   : > { %171 = vst [vmem:[%s1621_s26 + $0x20] sm:$0xff] %v170_v4   ;;  %v214_v15 = vld [vmem:[%s1616_s25 + $0xc0] sm:$0xff]   ;;  %v218_v16 = vld [vmem:[%s1616_s25 + $0xc8] sm:$0xff]   ;;  %v222_v17 = vld [vmem:[%s1616_s25 + $0xd0] sm:$0xff]  }
  0x16   : > { %175 = vst [vmem:[%s1621_s26 + $0x28] sm:$0xff] %v174_v5   ;;  %v226_v18 = vld [vmem:[%s1616_s25 + $0x120] sm:$0xff]   ;;  %v230_v19 = vld [vmem:[%s1616_s25 + $0x128] sm:$0xff]   ;;  %v234_v20 = vld [vmem:[%s1616_s25 + $0x130] sm:$0xff]  }
  0x17   : > { %179 = vst [vmem:[%s1621_s26 + $0x30] sm:$0xff] %v178_v6   ;;  %v238_v21 = vld [vmem:[%s1616_s25 + $0x138] sm:$0xff]   ;;  %v242_v22 = vld [vmem:[%s1616_s25 + $0x140] sm:$0xff]   ;;  %v246_v23 = vld [vmem:[%s1616_s25 + $0x148] sm:$0xff]  }
  0x18   : > { %183 = vst [vmem:[%s1621_s26 + $0x38] sm:$0xff] %v182_v7   ;;  %v250_v24 = vld [vmem:[%s1616_s25 + $0x150] sm:$0xff]   ;;  %v254_v25 = vld [vmem:[%s1616_s25 + $0x158] sm:$0xff]   ;;  %v258_v26 = vld [vmem:[%s1616_s25 + $0x160] sm:$0xff]  }
  0x19   : > { %187 = vst [vmem:[%s1621_s26 + $0x40] sm:$0xff] %v186_v8   ;;  %v262_v27 = vld [vmem:[%s1616_s25 + $0x1b0] sm:$0xff]   ;;  %v266_v28 = vld [vmem:[%s1616_s25 + $0x1b8] sm:$0xff]   ;;  %v270_v29 = vld [vmem:[%s1616_s25 + $0x1c0] sm:$0xff]  }
  0x1a   : > { %191 = vst [vmem:[%s1621_s26 + $0x48] sm:$0xff] %v190_v9   ;;  %v274_v30 = vld [vmem:[%s1616_s25 + $0x1c8] sm:$0xff]   ;;  %v278_v31 = vld [vmem:[%s1616_s25 + $0x1d0] sm:$0xff]   ;;  %v282_v32 = vld [vmem:[%s1616_s25 + $0x1d8] sm:$0xff]  }
  0x1b   : > { %195 = vst [vmem:[%s1621_s26 + $0x50] sm:$0xff] %v194_v10   ;;  %v286_v33 = vld [vmem:[%s1616_s25 + $0x1e0] sm:$0xff]   ;;  %v290_v34 = vld [vmem:[%s1616_s25 + $0x1e8] sm:$0xff]   ;;  %v294_v35 = vld [vmem:[%s1616_s25 + $0x1f0] sm:$0xff]  }
  0x1c   : > { %199 = vst [vmem:[%s1621_s26 + $0x58] sm:$0xff] %v198_v11  }
  0x1d   : > { %203 = vst [vmem:[%s1621_s26 + $0x60] sm:$0xff] %v202_v12  }
  0x1e   : > { %207 = vst [vmem:[%s1621_s26 + $0x68] sm:$0xff] %v206_v13  }
  0x1f   : > { %211 = vst [vmem:[%s1621_s26 + $0x70] sm:$0xff] %v210_v14  }
  0x20   : > { %215 = vst [vmem:[%s1621_s26 + $0x78] sm:$0xff] %v214_v15  }
  0x21   : > { %219 = vst [vmem:[%s1621_s26 + $0x80] sm:$0xff] %v218_v16  }
  0x22   : > { %223 = vst [vmem:[%s1621_s26 + $0x88] sm:$0xff] %v222_v17  }
  0x23   : > { %227 = vst [vmem:[%s1621_s26 + $0x90] sm:$0xff] %v226_v18  }
  0x24   : > { %231 = vst [vmem:[%s1621_s26 + $0x98] sm:$0xff] %v230_v19  }
  0x25   : > { %235 = vst [vmem:[%s1621_s26 + $0xa0] sm:$0xff] %v234_v20  }
  0x26   : > { %239 = vst [vmem:[%s1621_s26 + $0xa8] sm:$0xff] %v238_v21  }
  0x27   : > { %243 = vst [vmem:[%s1621_s26 + $0xb0] sm:$0xff] %v242_v22  }
  0x28   : > { %247 = vst [vmem:[%s1621_s26 + $0xb8] sm:$0xff] %v246_v23  }
  0x29   : > { %251 = vst [vmem:[%s1621_s26 + $0xc0] sm:$0xff] %v250_v24  }
  0x2a   : > { %255 = vst [vmem:[%s1621_s26 + $0xc8] sm:$0xff] %v254_v25  }
  0x2b   : > { %259 = vst [vmem:[%s1621_s26 + $0xd0] sm:$0xff] %v258_v26  }
  0x2c   : > { %263 = vst [vmem:[%s1621_s26 + $0xd8] sm:$0xff] %v262_v27  }
  0x2d   : > { %267 = vst [vmem:[%s1621_s26 + $0xe0] sm:$0xff] %v266_v28  }
  0x2e   : > { %271 = vst [vmem:[%s1621_s26 + $0xe8] sm:$0xff] %v270_v29  }
  0x2f   : > { %275 = vst [vmem:[%s1621_s26 + $0xf0] sm:$0xff] %v274_v30  }
  0x30   : > { %279 = vst [vmem:[%s1621_s26 + $0xf8] sm:$0xff] %v278_v31  }
  0x31   : > { %283 = vst [vmem:[%s1621_s26 + $0x100] sm:$0xff] %v282_v32  }
  0x32   : > { %287 = vst [vmem:[%s1621_s26 + $0x108] sm:$0xff] %v286_v33  }
  0x33   : > { %291 = vst [vmem:[%s1621_s26 + $0x110] sm:$0xff] %v290_v34  }
  0x34   : > { %295 = vst [vmem:[%s1621_s26 + $0x118] sm:$0xff] %v294_v35  }
  0x35 PF: > { %p1272_p5 = scmp.ge.s32.totalorder %s1559_s14, 1  ;;  %p464_p6 = scmp.lt.s32.totalorder %s1559_s14, 3 }
  0x37   : > { %p465_p7 = pnand %p1272_p5, %p464_p6 }
  0x38   : > { %s471_s4 = sand.u32 (!%p465_p7), 1, %s1551_s12   ;;  %s495_s9 = smul.u32 (!%p465_p7), 18, %s1267_s15 }
  0x39   : > { %468 = sbr.rel (%p465_p7) target bundleno = 355 (0x163), region = 69 }
  0x3a   : > { %s1510_s5 = smul.u32 (!%p465_p7), 288, %s471_s4  ;;  %p496_p8 = scmp.lt.s32.totalorder (!%p465_p7), %s495_s9, 35 }
  0x3c   : > { %s1704_s8 = scalar_lea.vmem (!%p465_p7), [#allocation2], %s1510_s5 }
  0x3e   : > { %v1424_v36 = vld [vmem:[%s1855_s1 + $0x8] sm:$0xf]  ;;  %v1502_v37 = vld [vmem:[%s1855_s1 + $0x8] sm:$0x10]  ;;  %vm878_vm0 = vcmask 1043456   ;;  %vm879_vm1 = vcmask 1044480  }
  0x3f   : > { %v1425_v38 = vor.u32 %v1502_v37, %v1424_v36  ;;  %v1561_v39 = vmov 65535   ;;  %v1501_v43 = vld [vmem:[%s1855_s1] sm:$0xff]  ;;  %v1474_v45 = vld [vmem:[%s1704_s8 + $0x48] sm:$0xff]  ;;  %vm769_vm2 = vcmask 203776   ;;  %v1483_v46 = vld [vmem:[%s1704_s8 + $0x90] sm:$0xff]  ;;  %s1862_s9 = smov (!%p496_p8, %s495_s9), 35 }
  0x40   : > { %v880_v40 = vsel %vm878_vm0, 4294967295, %v1561_v39  ;;  %v1465_v44 = vld [vmem:[%s1704_s8] sm:$0xff]  ;;  %v1492_v47 = vld [vmem:[%s1704_s8 + $0xd8] sm:$0xff]  ;;  %v1466_v48 = vld [vmem:[%s1704_s8 + $0x8] sm:$0xff]  ;;  %s1273_s12 = sshll.u32 %s1862_s9, 2  ;;  %vm1186_vm3 = vcmask 257024  }
  0x41   : > { %v881_v41 = vsel %vm879_vm1, %v880_v40, 0  ;;  %v1475_v49 = vld [vmem:[%s1704_s8 + $0x50] sm:$0xff]  ;;  %v1484_v50 = vld [vmem:[%s1704_s8 + $0x98] sm:$0xff]  ;;  %v1493_v51 = vld [vmem:[%s1704_s8 + $0xe0] sm:$0xff]  ;;  %s1789_s17 = scalar_lea.vmem %s1857_s3, %s1273_s12 }
  0x42   : > { %v883_v42 = vand.u32 %v1425_v38, %v881_v41  ;;  %v1467_v52 = vld [vmem:[%s1704_s8 + $0x10] sm:$0xff]  ;;  %v1476_v53 = vld [vmem:[%s1704_s8 + $0x58] sm:$0xff]  ;;  %v1485_v54 = vld [vmem:[%s1704_s8 + $0xa0] sm:$0xff] }
  0x43   : > { %v1494_v55 = vld [vmem:[%s1704_s8 + $0xe8] sm:$0xff]  ;;  %v1468_v56 = vld [vmem:[%s1704_s8 + $0x18] sm:$0xff]  ;;  %v1477_v57 = vld [vmem:[%s1704_s8 + $0x60] sm:$0xff] }
  0x44   : > { %891 = vmatpush.bf16.msra.mxu0 %v883_v42  ;;  %1503 = vmatpush.bf16.msra.mxu1 %v883_v42  ;;  %v1486_v58 = vld [vmem:[%s1704_s8 + $0xa8] sm:$0xff]  ;;  %v1495_v59 = vld [vmem:[%s1704_s8 + $0xf0] sm:$0xff]  ;;  %v1469_v60 = vld [vmem:[%s1704_s8 + $0x20] sm:$0xff] }
  0x45   : > { %1504 = vmatpush.bf16.msra.mxu2 %v883_v42  ;;  %1505 = vmatpush.bf16.msra.mxu3 %v883_v42  ;;  %v1478_v61 = vld [vmem:[%s1704_s8 + $0x68] sm:$0xff]  ;;  %v1487_v62 = vld [vmem:[%s1704_s8 + $0xb0] sm:$0xff]  ;;  %v1496_v63 = vld [vmem:[%s1704_s8 + $0xf8] sm:$0xff] }
  0x46   : > { %v1470_v0 = vld [vmem:[%s1704_s8 + $0x28] sm:$0xff]  ;;  %v1479_v1 = vld [vmem:[%s1704_s8 + $0x70] sm:$0xff]  ;;  %v1488_v2 = vld [vmem:[%s1704_s8 + $0xb8] sm:$0xff] }
  0x47   : > { %v1497_v3 = vld [vmem:[%s1704_s8 + $0x100] sm:$0xff]  ;;  %v1471_v4 = vld [vmem:[%s1704_s8 + $0x30] sm:$0xff]  ;;  %v1480_v5 = vld [vmem:[%s1704_s8 + $0x78] sm:$0xff] }
  0x48   : > { %892 = vmatpush.bf16.msra.mxu0 %v1501_v43  ;;  %1506 = vmatpush.bf16.msra.mxu1 %v1501_v43  ;;  %v1489_v6 = vld [vmem:[%s1704_s8 + $0xc0] sm:$0xff]  ;;  %v1498_v7 = vld [vmem:[%s1704_s8 + $0x108] sm:$0xff]  ;;  %v1472_v8 = vld [vmem:[%s1704_s8 + $0x38] sm:$0xff] }
  0x49   : > { %1507 = vmatpush.bf16.msra.mxu2 %v1501_v43  ;;  %1508 = vmatpush.bf16.msra.mxu3 %v1501_v43  ;;  %v1481_v9 = vld [vmem:[%s1704_s8 + $0x80] sm:$0xff]  ;;  %v1490_v10 = vld [vmem:[%s1704_s8 + $0xc8] sm:$0xff]  ;;  %v1499_v11 = vld [vmem:[%s1704_s8 + $0x110] sm:$0xff] }
  0x4a   : > { %v1473_v12 = vld [vmem:[%s1704_s8 + $0x40] sm:$0xff]  ;;  %v1482_v13 = vld [vmem:[%s1704_s8 + $0x88] sm:$0xff]  ;;  %v1491_v16 = vld [vmem:[%s1704_s8 + $0xd0] sm:$0xff] }
  0x4b   : > { %1426 = vmatmul.msk.bf16.vlgmr.msra.gmra.mxu0 %vm769_vm2, %v1465_v44  ;;  %1435 = vmatmul.msk.bf16.vlgmr.msra.gmra.mxu1 %vm769_vm2, %v1474_v45  ;;  %v1500_v17 = vld [vmem:[%s1704_s8 + $0x118] sm:$0xff]  ;;  %v1783_v22 = vld [vmem:[%s1856_s2] ss:$0 sm:$0xff] }
  0x4c   : > { %1444 = vmatmul.msk.bf16.vlgmr.msra.gmra.mxu2 %vm769_vm2, %v1483_v46  ;;  %1453 = vmatmul.msk.bf16.vlgmr.msra.gmra.mxu3 %vm769_vm2, %v1492_v47 }
  0x5b   : > { %1427 = vmatmul.msk.bf16.gmra.mxu0 %vm769_vm2, %v1466_v48  ;;  %1436 = vmatmul.msk.bf16.gmra.mxu1 %vm769_vm2, %v1475_v49 }
  0x5c   : > { %1445 = vmatmul.msk.bf16.gmra.mxu2 %vm769_vm2, %v1484_v50  ;;  %1454 = vmatmul.msk.bf16.gmra.mxu3 %vm769_vm2, %v1493_v51 }
  0x6b   : > { %1428 = vmatmul.msk.bf16.gmra.mxu0 %vm769_vm2, %v1467_v52  ;;  %1437 = vmatmul.msk.bf16.gmra.mxu1 %vm769_vm2, %v1476_v53 }
  0x6c   : > { %1446 = vmatmul.msk.bf16.gmra.mxu2 %vm769_vm2, %v1485_v54  ;;  %1455 = vmatmul.msk.bf16.gmra.mxu3 %vm769_vm2, %v1494_v55 }
  0x7b   : > { %1429 = vmatmul.msk.bf16.gmra.mxu0 %vm769_vm2, %v1468_v56  ;;  %1438 = vmatmul.msk.bf16.gmra.mxu1 %vm769_vm2, %v1477_v57 }
  0x7c   : > { %1447 = vmatmul.msk.bf16.gmra.mxu2 %vm769_vm2, %v1486_v58  ;;  %1456 = vmatmul.msk.bf16.gmra.mxu3 %vm769_vm2, %v1495_v59 }
  0x8b   : > { %1430 = vmatmul.msk.bf16.gmra.mxu0 %vm769_vm2, %v1469_v60  ;;  %1439 = vmatmul.msk.bf16.gmra.mxu1 %vm769_vm2, %v1478_v61 }
  0x8c   : > { %1448 = vmatmul.msk.bf16.gmra.mxu2 %vm769_vm2, %v1487_v62  ;;  %1457 = vmatmul.msk.bf16.gmra.mxu3 %vm769_vm2, %v1496_v63 }
  0x9b   : > { %1431 = vmatmul.msk.bf16.gmra.mxu0 %vm769_vm2, %v1470_v0  ;;  %1440 = vmatmul.msk.bf16.gmra.mxu1 %vm769_vm2, %v1479_v1 }
  0x9c   : > { %1449 = vmatmul.msk.bf16.gmra.mxu2 %vm769_vm2, %v1488_v2  ;;  %1458 = vmatmul.msk.bf16.gmra.mxu3 %vm769_vm2, %v1497_v3 }
  0xab   : > { %1432 = vmatmul.msk.bf16.gmra.mxu0 %vm769_vm2, %v1471_v4  ;;  %1441 = vmatmul.msk.bf16.gmra.mxu1 %vm769_vm2, %v1480_v5 }
  0xac   : > { %1450 = vmatmul.msk.bf16.gmra.mxu2 %vm769_vm2, %v1489_v6  ;;  %1459 = vmatmul.msk.bf16.gmra.mxu3 %vm769_vm2, %v1498_v7 }
  0xbb   : > { %1433 = vmatmul.msk.bf16.gmra.mxu0 %vm769_vm2, %v1472_v8  ;;  %1442 = vmatmul.msk.bf16.gmra.mxu1 %vm769_vm2, %v1481_v9 }
  0xbc   : > { %1451 = vmatmul.msk.bf16.gmra.mxu2 %vm769_vm2, %v1490_v10  ;;  %1460 = vmatmul.msk.bf16.gmra.mxu3 %vm769_vm2, %v1499_v11 }
  0xc8   : > { %v894_v14 = vpop.f32.mrf.mxu0  ;;  %v939_v15 = vpop.f32.mrf.mxu1 }
  0xc9   : > { %v1074_v18 = vmax.f32 %v894_v14, %v939_v15 }
  0xcb   : > { %1434 = vmatmul.msk.bf16.gmra.mxu0 %vm769_vm2, %v1473_v12  ;;  %1443 = vmatmul.msk.bf16.gmra.mxu1 %vm769_vm2, %v1482_v13 }
  0xcc   : > { %1452 = vmatmul.msk.bf16.gmra.mxu2 %vm769_vm2, %v1491_v16  ;;  %1461 = vmatmul.msk.bf16.gmra.mxu3 %vm769_vm2, %v1500_v17 }
  0xcf   : > { %v984_v19 = vpop.f32.mrf.mxu2  ;;  %v1029_v20 = vpop.f32.mrf.mxu3 }
  0xd0   : > { %v1092_v21 = vmax.f32 %v984_v19, %v1029_v20  ;;  %v896_v23 = vpop.f32.mrf.mxu0  ;;  %v941_v24 = vpop.f32.mrf.mxu1 }
  0xd1   : > { %v1075_v31 = vmax.f32 %v896_v23, %v941_v24 }
  0xd2   : > { %v1110_v25 = vmax.f32 %v1074_v18, %v1092_v21 }
  0xd4   : > { %v1132_v26 = vadd.f32 %v1783_v22, %v1110_v25 }
  0xd6   : > { %v1150_v27 = vmax.f32 %v1132_v26, 0.0 }
  0xd7   : > { %v986_v28 = vpop.f32.mrf.mxu2  ;;  %v1031_v29 = vpop.f32.mrf.mxu3 }
  0xd8   : > { %v1168_v30 = vpack.c.bf16 %v1150_v27, %v1150_v27  ;;  %v1093_v32 = vmax.f32 %v986_v28, %v1031_v29  ;;  %v899_v33 = vpop.f32.mrf.mxu0  ;;  %v944_v34 = vpop.f32.mrf.mxu1 }
  0xd9   : > { %v1076_v38 = vmax.f32 %v899_v33, %v944_v34 }
  0xda   : > { %1187 = vst.msk [vmem:[%s1789_s17] sm:$0xf] %vm1186_vm3, %v1168_v30  ;;  %v1111_v35 = vmax.f32 %v1075_v31, %v1093_v32 }
  0xdc   : > { %v1133_v36 = vadd.f32 %v1783_v22, %v1111_v35 }
  0xde   : > { %v1151_v37 = vmax.f32 %v1133_v36, 0.0 }
  0xdf   : > { %v989_v39 = vpop.f32.mrf.mxu2  ;;  %v1034_v40 = vpop.f32.mrf.mxu3 }
  0xe0   : > { %v1169_v41 = vpack.c.bf16 %v1151_v37, %v1151_v37  ;;  %v1094_v42 = vmax.f32 %v989_v39, %v1034_v40  ;;  %v901_v43 = vpop.f32.mrf.mxu0  ;;  %v946_v44 = vpop.f32.mrf.mxu1 }
  0xe1   : > { %v1077_v51 = vmax.f32 %v901_v43, %v946_v44 }
  0xe2   : > { %1188 = vst.msk [vmem:[%s1789_s17 + $0x4] sm:$0xf] %vm1186_vm3, %v1169_v41  ;;  %v1112_v45 = vmax.f32 %v1076_v38, %v1094_v42 }
  0xe4   : > { %v1134_v46 = vadd.f32 %v1783_v22, %v1112_v45 }
  0xe6   : > { %v1152_v47 = vmax.f32 %v1134_v46, 0.0 }
  0xe7   : > { %v991_v48 = vpop.f32.mrf.mxu2  ;;  %v1036_v49 = vpop.f32.mrf.mxu3 }
  0xe8   : > { %v1170_v50 = vpack.c.bf16 %v1152_v47, %v1152_v47  ;;  %v1095_v52 = vmax.f32 %v991_v48, %v1036_v49  ;;  %v904_v53 = vpop.f32.mrf.mxu0  ;;  %v949_v54 = vpop.f32.mrf.mxu1 }
  0xe9   : > { %v1078_v58 = vmax.f32 %v904_v53, %v949_v54 }
  0xea   : > { %1189 = vst.msk [vmem:[%s1789_s17 + $0x8] sm:$0xf] %vm1186_vm3, %v1170_v50  ;;  %v1113_v55 = vmax.f32 %v1077_v51, %v1095_v52 }
  0xec   : > { %v1135_v56 = vadd.f32 %v1783_v22, %v1113_v55 }
  0xee   : > { %v1153_v57 = vmax.f32 %v1135_v56, 0.0 }
  0xef   : > { %v994_v59 = vpop.f32.mrf.mxu2  ;;  %v1039_v60 = vpop.f32.mrf.mxu3 }
  0xf0   : > { %v1171_v61 = vpack.c.bf16 %v1153_v57, %v1153_v57  ;;  %v1096_v62 = vmax.f32 %v994_v59, %v1039_v60  ;;  %v906_v63 = vpop.f32.mrf.mxu0  ;;  %v951_v0 = vpop.f32.mrf.mxu1 }
  0xf1   : > { %v1079_v7 = vmax.f32 %v906_v63, %v951_v0 }
  0xf2   : > { %1190 = vst.msk [vmem:[%s1789_s17 + $0xc] sm:$0xf] %vm1186_vm3, %v1171_v61  ;;  %v1114_v1 = vmax.f32 %v1078_v58, %v1096_v62 }
  0xf4   : > { %v1136_v2 = vadd.f32 %v1783_v22, %v1114_v1 }
  0xf6   : > { %v1154_v3 = vmax.f32 %v1136_v2, 0.0 }
  0xf7   : > { %v996_v4 = vpop.f32.mrf.mxu2  ;;  %v1041_v5 = vpop.f32.mrf.mxu3 }
  0xf8   : > { %v1172_v6 = vpack.c.bf16 %v1154_v3, %v1154_v3  ;;  %v1097_v8 = vmax.f32 %v996_v4, %v1041_v5  ;;  %v909_v9 = vpop.f32.mrf.mxu0  ;;  %v954_v10 = vpop.f32.mrf.mxu1 }
  0xf9   : > { %v1080_v14 = vmax.f32 %v909_v9, %v954_v10 }
  0xfa   : > { %1191 = vst.msk [vmem:[%s1789_s17 + $0x10] sm:$0xf] %vm1186_vm3, %v1172_v6  ;;  %v1115_v11 = vmax.f32 %v1079_v7, %v1097_v8 }
  0xfc   : > { %v1137_v12 = vadd.f32 %v1783_v22, %v1115_v11 }
  0xfe   : > { %v1155_v13 = vmax.f32 %v1137_v12, 0.0 }
  0xff   : > { %v999_v15 = vpop.f32.mrf.mxu2  ;;  %v1044_v16 = vpop.f32.mrf.mxu3 }
 0x100   : > { %v1173_v17 = vpack.c.bf16 %v1155_v13, %v1155_v13  ;;  %v1098_v18 = vmax.f32 %v999_v15, %v1044_v16  ;;  %v911_v19 = vpop.f32.mrf.mxu0  ;;  %v956_v20 = vpop.f32.mrf.mxu1 }
 0x101   : > { %v1081_v28 = vmax.f32 %v911_v19, %v956_v20 }
 0x102   : > { %1192 = vst.msk [vmem:[%s1789_s17 + $0x14] sm:$0xf] %vm1186_vm3, %v1173_v17  ;;  %v1116_v21 = vmax.f32 %v1080_v14, %v1098_v18 }
 0x104   : > { %v1138_v23 = vadd.f32 %v1783_v22, %v1116_v21 }
 0x106   : > { %v1156_v24 = vmax.f32 %v1138_v23, 0.0 }
 0x107   : > { %v1001_v25 = vpop.f32.mrf.mxu2  ;;  %v1046_v26 = vpop.f32.mrf.mxu3 }
 0x108   : > { %v1174_v27 = vpack.c.bf16 %v1156_v24, %v1156_v24  ;;  %v1099_v29 = vmax.f32 %v1001_v25, %v1046_v26  ;;  %v914_v30 = vpop.f32.mrf.mxu0  ;;  %v959_v31 = vpop.f32.mrf.mxu1 }
 0x109   : > { %v1082_v35 = vmax.f32 %v914_v30, %v959_v31 }
 0x10a   : > { %1193 = vst.msk [vmem:[%s1789_s17 + $0x18] sm:$0xf] %vm1186_vm3, %v1174_v27  ;;  %v1117_v32 = vmax.f32 %v1081_v28, %v1099_v29 }
 0x10c   : > { %v1139_v33 = vadd.f32 %v1783_v22, %v1117_v32 }
 0x10e   : > { %v1157_v34 = vmax.f32 %v1139_v33, 0.0 }
 0x10f   : > { %v1004_v36 = vpop.f32.mrf.mxu2  ;;  %v1049_v37 = vpop.f32.mrf.mxu3 }
 0x110   : > { %v1175_v38 = vpack.c.bf16 %v1157_v34, %v1157_v34  ;;  %v1100_v39 = vmax.f32 %v1004_v36, %v1049_v37  ;;  %v916_v40 = vpop.f32.mrf.mxu0  ;;  %v961_v41 = vpop.f32.mrf.mxu1 }
 0x111   : > { %v1083_v48 = vmax.f32 %v916_v40, %v961_v41 }
 0x112   : > { %1194 = vst.msk [vmem:[%s1789_s17 + $0x1c] sm:$0xf] %vm1186_vm3, %v1175_v38  ;;  %v1118_v42 = vmax.f32 %v1082_v35, %v1100_v39 }
 0x114   : > { %v1140_v43 = vadd.f32 %v1783_v22, %v1118_v42 }
 0x116   : > { %v1158_v44 = vmax.f32 %v1140_v43, 0.0 }
 0x117   : > { %v1006_v45 = vpop.f32.mrf.mxu2  ;;  %v1051_v46 = vpop.f32.mrf.mxu3 }
 0x118   : > { %v1176_v47 = vpack.c.bf16 %v1158_v44, %v1158_v44  ;;  %v1101_v49 = vmax.f32 %v1006_v45, %v1051_v46  ;;  %v919_v50 = vpop.f32.mrf.mxu0  ;;  %v964_v51 = vpop.f32.mrf.mxu1 }
 0x119   : > { %v1084_v55 = vmax.f32 %v919_v50, %v964_v51 }
 0x11a   : > { %1195 = vst.msk [vmem:[%s1789_s17 + $0x20] sm:$0xf] %vm1186_vm3, %v1176_v47  ;;  %v1119_v52 = vmax.f32 %v1083_v48, %v1101_v49 }
 0x11c   : > { %v1141_v53 = vadd.f32 %v1783_v22, %v1119_v52 }
 0x11e   : > { %v1159_v54 = vmax.f32 %v1141_v53, 0.0 }
 0x11f   : > { %v1009_v56 = vpop.f32.mrf.mxu2  ;;  %v1054_v57 = vpop.f32.mrf.mxu3 }
 0x120   : > { %v1177_v58 = vpack.c.bf16 %v1159_v54, %v1159_v54  ;;  %v1102_v59 = vmax.f32 %v1009_v56, %v1054_v57  ;;  %v921_v60 = vpop.f32.mrf.mxu0  ;;  %v966_v61 = vpop.f32.mrf.mxu1 }
 0x121   : > { %v1085_v4 = vmax.f32 %v921_v60, %v966_v61 }
 0x122   : > { %1196 = vst.msk [vmem:[%s1789_s17 + $0x24] sm:$0xf] %vm1186_vm3, %v1177_v58  ;;  %v1120_v62 = vmax.f32 %v1084_v55, %v1102_v59 }
 0x124   : > { %v1142_v63 = vadd.f32 %v1783_v22, %v1120_v62 }
 0x126   : > { %v1160_v0 = vmax.f32 %v1142_v63, 0.0 }
 0x127   : > { %v1011_v1 = vpop.f32.mrf.mxu2  ;;  %v1056_v2 = vpop.f32.mrf.mxu3 }
 0x128   : > { %v1178_v3 = vpack.c.bf16 %v1160_v0, %v1160_v0  ;;  %v1103_v5 = vmax.f32 %v1011_v1, %v1056_v2  ;;  %v924_v6 = vpop.f32.mrf.mxu0  ;;  %v969_v7 = vpop.f32.mrf.mxu1 }
 0x129   : > { %v1086_v11 = vmax.f32 %v924_v6, %v969_v7 }
 0x12a   : > { %1197 = vst.msk [vmem:[%s1789_s17 + $0x28] sm:$0xf] %vm1186_vm3, %v1178_v3  ;;  %v1121_v8 = vmax.f32 %v1085_v4, %v1103_v5 }
 0x12c   : > { %v1143_v9 = vadd.f32 %v1783_v22, %v1121_v8 }
 0x12e   : > { %v1161_v10 = vmax.f32 %v1143_v9, 0.0 }
 0x12f   : > { %v1014_v12 = vpop.f32.mrf.mxu2  ;;  %v1059_v13 = vpop.f32.mrf.mxu3 }
 0x130   : > { %v1179_v14 = vpack.c.bf16 %v1161_v10, %v1161_v10  ;;  %v1104_v15 = vmax.f32 %v1014_v12, %v1059_v13  ;;  %v926_v16 = vpop.f32.mrf.mxu0  ;;  %v971_v17 = vpop.f32.mrf.mxu1 }
 0x131   : > { %v1087_v25 = vmax.f32 %v926_v16, %v971_v17 }
 0x132   : > { %1198 = vst.msk [vmem:[%s1789_s17 + $0x2c] sm:$0xf] %vm1186_vm3, %v1179_v14  ;;  %v1122_v18 = vmax.f32 %v1086_v11, %v1104_v15 }
 0x134   : > { %v1144_v19 = vadd.f32 %v1783_v22, %v1122_v18 }
 0x136   : > { %v1162_v20 = vmax.f32 %v1144_v19, 0.0 }
 0x137   : > { %v1016_v21 = vpop.f32.mrf.mxu2  ;;  %v1061_v23 = vpop.f32.mrf.mxu3 }
 0x138   : > { %v1180_v24 = vpack.c.bf16 %v1162_v20, %v1162_v20  ;;  %v1105_v26 = vmax.f32 %v1016_v21, %v1061_v23  ;;  %v929_v27 = vpop.f32.mrf.mxu0  ;;  %v974_v28 = vpop.f32.mrf.mxu1 }
 0x139   : > { %v1088_v32 = vmax.f32 %v929_v27, %v974_v28 }
 0x13a   : > { %1199 = vst.msk [vmem:[%s1789_s17 + $0x30] sm:$0xf] %vm1186_vm3, %v1180_v24  ;;  %v1123_v29 = vmax.f32 %v1087_v25, %v1105_v26 }
 0x13c   : > { %v1145_v30 = vadd.f32 %v1783_v22, %v1123_v29 }
 0x13e   : > { %v1163_v31 = vmax.f32 %v1145_v30, 0.0 }
 0x13f   : > { %v1019_v33 = vpop.f32.mrf.mxu2  ;;  %v1064_v34 = vpop.f32.mrf.mxu3 }
 0x140   : > { %v1181_v35 = vpack.c.bf16 %v1163_v31, %v1163_v31  ;;  %v1106_v36 = vmax.f32 %v1019_v33, %v1064_v34  ;;  %v931_v37 = vpop.f32.mrf.mxu0  ;;  %v976_v38 = vpop.f32.mrf.mxu1 }
 0x141   : > { %v1089_v45 = vmax.f32 %v931_v37, %v976_v38 }
 0x142   : > { %1200 = vst.msk [vmem:[%s1789_s17 + $0x34] sm:$0xf] %vm1186_vm3, %v1181_v35  ;;  %v1124_v39 = vmax.f32 %v1088_v32, %v1106_v36 }
 0x144   : > { %v1146_v40 = vadd.f32 %v1783_v22, %v1124_v39 }
 0x146   : > { %v1164_v41 = vmax.f32 %v1146_v40, 0.0 }
 0x147   : > { %v1021_v42 = vpop.f32.mrf.mxu2  ;;  %v1066_v43 = vpop.f32.mrf.mxu3 }
 0x148   : > { %v1182_v44 = vpack.c.bf16 %v1164_v41, %v1164_v41  ;;  %v1107_v46 = vmax.f32 %v1021_v42, %v1066_v43  ;;  %v934_v48 = vpop.f32.mrf.mxu0  ;;  %v979_v49 = vpop.f32.mrf.mxu1 }
 0x149   : > { %v1090_v52 = vmax.f32 %v934_v48, %v979_v49 }
 0x14a   : > { %1201 = vst.msk [vmem:[%s1789_s17 + $0x38] sm:$0xf] %vm1186_vm3, %v1182_v44  ;;  %v1125_v47 = vmax.f32 %v1089_v45, %v1107_v46 }
 0x14c   : > { %v1147_v50 = vadd.f32 %v1783_v22, %v1125_v47 }
 0x14e   : > { %v1165_v51 = vmax.f32 %v1147_v50, 0.0 }
 0x14f   : > { %v1024_v53 = vpop.f32.mrf.mxu2  ;;  %v1069_v54 = vpop.f32.mrf.mxu3 }
 0x150   : > { %v1183_v55 = vpack.c.bf16 %v1165_v51, %v1165_v51  ;;  %v1108_v56 = vmax.f32 %v1024_v53, %v1069_v54  ;;  %v936_v59 = vpop.f32.mrf.mxu0  ;;  %v981_v60 = vpop.f32.mrf.mxu1 }
 0x151   : > { %v1091_v1 = vmax.f32 %v936_v59, %v981_v60 }
 0x152   : > { %1202 = vst.msk [vmem:[%s1789_s17 + $0x3c] sm:$0xf] %vm1186_vm3, %v1183_v55  ;;  %v1126_v57 = vmax.f32 %v1090_v52, %v1108_v56 }
 0x154   : > { %v1148_v58 = vadd.f32 %v1783_v22, %v1126_v57 }
 0x156   : > { %v1166_v61 = vmax.f32 %v1148_v58, 0.0 }
 0x157   : > { %v1026_v62 = vpop.f32.mrf.mxu2  ;;  %v1071_v63 = vpop.f32.mrf.mxu3 }
 0x158   : > { %v1184_v0 = vpack.c.bf16 %v1166_v61, %v1166_v61  ;;  %v1109_v2 = vmax.f32 %v1026_v62, %v1071_v63 }
 0x15a   : > { %1203 = vst.msk [vmem:[%s1789_s17 + $0x40] sm:$0xf] %vm1186_vm3, %v1184_v0  ;;  %v1127_v3 = vmax.f32 %v1091_v1, %v1109_v2 }
 0x15c   : > { %v1149_v4 = vadd.f32 %v1783_v22, %v1127_v3 }
 0x15e   : > { %v1167_v5 = vmax.f32 %v1149_v4, 0.0 }
 0x160   : > { %v1185_v6 = vpack.c.bf16 %v1167_v5, %v1167_v5 }
 0x162   : > { %1204 = vst.msk [vmem:[%s1789_s17 + $0x44] sm:$0xf] %vm1186_vm3, %v1185_v6 }
 0x163 PF: > { %p10_p9 = scmp.ge.s32.totalorder %s1599_s16, 4   ;;  %s1858_s12 = smov %s1555_s13 }
 0x164   : > { %s1859_s13 = smov %s1608_s19  ;;  %s1860_s14 = smov %s1599_s16 }
 0x165   :  { %12 = sbr.rel (!%p10_p9) target bundleno = 2 (0x2), region = 108 }

// kernel: dnn_forward.4
= control target key start
LH: loop header
LB: loop body
LE: loop exit
PB: predicated region body
PF: predicated region fallthrough
CT: control target
= control target key end

     0   :  { %vm254_vm0 = vcmask 1044480   ;;  %vm229_vm1 = vcmask 998400   ;;  %vm384_vm2 = vcmask 257024   ;;  %s772_s1 = inlined_call_operand.vmem [shape: bf16[250,32], index: 1, kind: input, shape index: {}]   ;;  %s773_s0 = inlined_call_operand.vmem [shape: bf16[4,32,250], index: 0, kind: input, shape index: {}]   ;;  %s774_s2 = inlined_call_operand.vmem [shape: f32[1,32], index: 2, kind: input, shape index: {}]   ;;  %s775_s3 = inlined_call_operand.vmem [shape: bf16[32,32], index: 3, kind: output, shape index: {}]  }
   0x1   :  { %v552_v0 = vld [vmem:[%s772_s1 + $0x38] sm:$0xff]  ;;  %v551_v4 = vld [vmem:[%s772_s1 + $0x30] sm:$0xff]  ;;  %v550_v7 = vld [vmem:[%s772_s1 + $0x28] sm:$0xff] }
   0x2   :  { %v519_v1 = vld [vmem:[%s772_s1 + $0x78] sm:$0xf]  ;;  %v560_v2 = vld [vmem:[%s772_s1 + $0x78] sm:$0x10]  ;;  %258 = vmatpush.bf16.msra.mxu0 %v552_v0  ;;  %561 = vmatpush.bf16.msra.mxu2 %v552_v0  ;;  %v559_v6 = vld [vmem:[%s772_s1 + $0x70] sm:$0xff] }
   0x3   :  { %v520_v3 = vor.u32 %v560_v2, %v519_v1  ;;  %v558_v8 = vld [vmem:[%s772_s1 + $0x68] sm:$0xff]  ;;  %v549_v9 = vld [vmem:[%s772_s1 + $0x20] sm:$0xff]  ;;  %v548_v11 = vld [vmem:[%s772_s1 + $0x18] sm:$0xff] }
   0x4   :  { %v557_v10 = vld [vmem:[%s772_s1 + $0x60] sm:$0xff]  ;;  %v556_v12 = vld [vmem:[%s772_s1 + $0x58] sm:$0xff]  ;;  %v547_v13 = vld [vmem:[%s772_s1 + $0x10] sm:$0xff] }
   0x5   :  { %v256_v5 = vsel %vm254_vm0, %v520_v3, 0  ;;  %v555_v14 = vld [vmem:[%s772_s1 + $0x50] sm:$0xff]  ;;  %v546_v15 = vld [vmem:[%s772_s1 + $0x8] sm:$0xff]  ;;  %v545_v17 = vld [vmem:[%s772_s1] sm:$0xff] }
   0x6   :  { %307 = vmatpush.bf16.msra.mxu1 %v256_v5  ;;  %569 = vmatpush.bf16.msra.mxu3 %v256_v5  ;;  %v554_v16 = vld [vmem:[%s772_s1 + $0x48] sm:$0xff]  ;;  %v395_v18 = vld [vmem:[%s773_s0] sm:$0xf]  ;;  %v529_v23 = vld [vmem:[%s773_s0 + $0x4] sm:$0xf] }
   0x7   :  { %259 = vmatpush.bf16.msra.mxu0 %v551_v4  ;;  %562 = vmatpush.bf16.msra.mxu2 %v551_v4  ;;  %v530_v19 = vld [vmem:[%s773_s0 + $0x4] sm:$0xf0]  ;;  %v427_v20 = vld [vmem:[%s773_s0 + $0x40] sm:$0xf]  ;;  %v397_v24 = vld [vmem:[%s773_s0 + $0x8] sm:$0xf0] }
   0x8   :  { %v538_v21 = vld [vmem:[%s773_s0 + $0x44] sm:$0xf0]  ;;  %v553_v22 = vld [vmem:[%s772_s1 + $0x40] sm:$0xff]  ;;  %v429_v26 = vld [vmem:[%s773_s0 + $0x48] sm:$0xf0]  ;;  %v396_v27 = vor.u32 %v530_v19, %v395_v18  ;;  %v400_v29 = vor.u32 %v529_v23, %v397_v24 }
   0x9   :  { %v537_v25 = vld [vmem:[%s773_s0 + $0x44] sm:$0xf]  ;;  %v428_v28 = vor.u32 %v538_v21, %v427_v20  ;;  %v403_v31 = vld [vmem:[%s773_s0 + $0x10] sm:$0xf]  ;;  %v532_v32 = vld [vmem:[%s773_s0 + $0x14] sm:$0xf0] }
   0xa   :  { %308 = vmatpush.bf16.msra.mxu1 %v559_v6  ;;  %570 = vmatpush.bf16.msra.mxu3 %v559_v6  ;;  %v432_v30 = vor.u32 %v537_v25, %v429_v26  ;;  %v435_v33 = vld [vmem:[%s773_s0 + $0x50] sm:$0xf]  ;;  %v540_v34 = vld [vmem:[%s773_s0 + $0x54] sm:$0xf0]  ;;  %v531_v35 = vld [vmem:[%s773_s0 + $0x14] sm:$0xf]  ;;  %v404_v39 = vor.u32 %v532_v32, %v403_v31 }
   0xb   :  { %260 = vmatpush.bf16.msra.mxu0 %v550_v7  ;;  %563 = vmatpush.bf16.msra.mxu2 %v550_v7  ;;  %v405_v36 = vld [vmem:[%s773_s0 + $0x18] sm:$0xf0]  ;;  %v539_v37 = vld [vmem:[%s773_s0 + $0x54] sm:$0xf]  ;;  %v436_v40 = vor.u32 %v540_v34, %v435_v33  ;;  %v411_v43 = vld [vmem:[%s773_s0 + $0x20] sm:$0xf] }
   0xc   :  { %v437_v38 = vld [vmem:[%s773_s0 + $0x58] sm:$0xf0]  ;;  %v408_v41 = vor.u32 %v531_v35, %v405_v36  ;;  %v534_v44 = vld [vmem:[%s773_s0 + $0x24] sm:$0xf0]  ;;  %v443_v45 = vld [vmem:[%s773_s0 + $0x60] sm:$0xf] }
   0xd   :  { %v440_v42 = vor.u32 %v539_v37, %v437_v38  ;;  %v542_v46 = vld [vmem:[%s773_s0 + $0x64] sm:$0xf0]  ;;  %v533_v47 = vld [vmem:[%s773_s0 + $0x24] sm:$0xf]  ;;  %v413_v48 = vld [vmem:[%s773_s0 + $0x28] sm:$0xf0]  ;;  %v412_v51 = vor.u32 %v534_v44, %v411_v43 }
   0xe   :  { %309 = vmatpush.bf16.msra.mxu1 %v558_v8  ;;  %571 = vmatpush.bf16.msra.mxu3 %v558_v8  ;;  %v541_v49 = vld [vmem:[%s773_s0 + $0x64] sm:$0xf]  ;;  %v445_v50 = vld [vmem:[%s773_s0 + $0x68] sm:$0xf0]  ;;  %v444_v52 = vor.u32 %v542_v46, %v443_v45  ;;  %v416_v53 = vor.u32 %v533_v47, %v413_v48  ;;  %v419_v55 = vld [vmem:[%s773_s0 + $0x30] sm:$0xf] }
   0xf   :  { %261 = vmatpush.bf16.msra.mxu0 %v549_v9  ;;  %564 = vmatpush.bf16.msra.mxu2 %v549_v9  ;;  %v448_v54 = vor.u32 %v541_v49, %v445_v50  ;;  %v536_v56 = vld [vmem:[%s773_s0 + $0x34] sm:$0xf0]  ;;  %v451_v57 = vld [vmem:[%s773_s0 + $0x70] sm:$0xf]  ;;  %v535_v59 = vld [vmem:[%s773_s0 + $0x34] sm:$0xf] }
  0x10   :  { %v544_v58 = vld [vmem:[%s773_s0 + $0x74] sm:$0xf0]  ;;  %v421_v60 = vld [vmem:[%s773_s0 + $0x38] sm:$0xf0]  ;;  %v543_v61 = vld [vmem:[%s773_s0 + $0x74] sm:$0xf]  ;;  %v420_v63 = vor.u32 %v536_v56, %v419_v55 }
  0x11   :  { %v453_v62 = vld [vmem:[%s773_s0 + $0x78] sm:$0xf0]  ;;  %v452_v0 = vor.u32 %v544_v58, %v451_v57  ;;  %v424_v1 = vor.u32 %v535_v59, %v421_v60  ;;  %v577_v31 = vld [vmem:[%s774_s2] ss:$0 sm:$0xff] }
  0x12   :  { %310 = vmatpush.bf16.msra.mxu1 %v557_v10  ;;  %572 = vmatpush.bf16.msra.mxu3 %v557_v10  ;;  %v456_v2 = vor.u32 %v543_v61, %v453_v62 }
  0x13   :  { %262 = vmatpush.bf16.msra.mxu0 %v548_v11  ;;  %565 = vmatpush.bf16.msra.mxu2 %v548_v11 }
  0x16   :  { %311 = vmatpush.bf16.msra.mxu1 %v556_v12  ;;  %573 = vmatpush.bf16.msra.mxu3 %v556_v12 }
  0x17   :  { %263 = vmatpush.bf16.msra.mxu0 %v547_v13  ;;  %566 = vmatpush.bf16.msra.mxu2 %v547_v13 }
  0x1a   :  { %312 = vmatpush.bf16.msra.mxu1 %v555_v14  ;;  %574 = vmatpush.bf16.msra.mxu3 %v555_v14 }
  0x1b   :  { %264 = vmatpush.bf16.msra.mxu0 %v546_v15  ;;  %567 = vmatpush.bf16.msra.mxu2 %v546_v15 }
  0x1e   :  { %313 = vmatpush.bf16.msra.mxu1 %v554_v16  ;;  %575 = vmatpush.bf16.msra.mxu3 %v554_v16 }
  0x1f   :  { %265 = vmatpush.bf16.msra.mxu0 %v545_v17  ;;  %568 = vmatpush.bf16.msra.mxu2 %v545_v17 }
  0x22   :  { %314 = vmatpush.bf16.msra.mxu1 %v553_v22  ;;  %576 = vmatpush.bf16.msra.mxu3 %v553_v22 }
  0x23   :  { %266 = vmatmul.bf16.vlgmr.msra.gmra.mxu0 %v396_v27  ;;  %286 = vmatmul.bf16.vlgmr.msra.gmra.mxu2 %v428_v28 }
  0x25   :  { %521 = vmatmul.msk.bf16.vlgmr.msra.gmra.mxu1 %vm229_vm1, %v400_v29  ;;  %525 = vmatmul.msk.bf16.vlgmr.msra.gmra.mxu3 %vm229_vm1, %v432_v30 }
  0x33   :  { %271 = vmatmul.bf16.gmra.mxu0 %v404_v39  ;;  %291 = vmatmul.bf16.gmra.mxu2 %v436_v40 }
  0x35   :  { %522 = vmatmul.msk.bf16.gmra.mxu1 %vm229_vm1, %v408_v41  ;;  %526 = vmatmul.msk.bf16.gmra.mxu3 %vm229_vm1, %v440_v42 }
  0x43   :  { %276 = vmatmul.bf16.gmra.mxu0 %v412_v51  ;;  %296 = vmatmul.bf16.gmra.mxu2 %v444_v52 }
  0x45   :  { %523 = vmatmul.msk.bf16.gmra.mxu1 %vm229_vm1, %v416_v53  ;;  %527 = vmatmul.msk.bf16.gmra.mxu3 %vm229_vm1, %v448_v54 }
  0x53   :  { %281 = vmatmul.bf16.gmra.mxu0 %v420_v63  ;;  %301 = vmatmul.bf16.gmra.mxu2 %v452_v0 }
  0x55   :  { %524 = vmatmul.msk.bf16.gmra.mxu1 %vm229_vm1, %v424_v1  ;;  %528 = vmatmul.msk.bf16.gmra.mxu3 %vm229_vm1, %v456_v2 }
  0xa0   :  { %v267_v3 = vpop.f32.mrf.mxu0 }
  0xa2   :  { %v316_v4 = vpop.f32.mrf.mxu1 }
  0xa3   :  { %v317_v24 = vadd.f32 %v316_v4, %v267_v3 }
  0xa6   :  { %v287_v5 = vpop.f32.mrf.mxu2 }
  0xa8   :  { %v336_v6 = vpop.f32.mrf.mxu3  ;;  %v269_v7 = vpop.f32.mrf.mxu0 }
  0xa9   :  { %v337_v25 = vadd.f32 %v336_v6, %v287_v5 }
  0xaa   :  { %v318_v8 = vpop.f32.mrf.mxu1 }
  0xab   :  { %v319_v37 = vadd.f32 %v318_v8, %v269_v7 }
  0xae   :  { %v289_v9 = vpop.f32.mrf.mxu2 }
  0xb0   :  { %v338_v10 = vpop.f32.mrf.mxu3  ;;  %v272_v11 = vpop.f32.mrf.mxu0 }
  0xb1   :  { %v339_v38 = vadd.f32 %v338_v10, %v289_v9 }
  0xb2   :  { %v321_v12 = vpop.f32.mrf.mxu1 }
  0xb3   :  { %v322_v51 = vadd.f32 %v321_v12, %v272_v11 }
  0xb6   :  { %v292_v13 = vpop.f32.mrf.mxu2 }
  0xb8   :  { %v341_v14 = vpop.f32.mrf.mxu3  ;;  %v274_v15 = vpop.f32.mrf.mxu0 }
  0xb9   :  { %v342_v52 = vadd.f32 %v341_v14, %v292_v13 }
  0xba   :  { %v323_v16 = vpop.f32.mrf.mxu1 }
  0xbb   :  { %v324_v1 = vadd.f32 %v323_v16, %v274_v15 }
  0xbe   :  { %v294_v17 = vpop.f32.mrf.mxu2 }
  0xc0   :  { %v343_v18 = vpop.f32.mrf.mxu3  ;;  %v277_v19 = vpop.f32.mrf.mxu0 }
  0xc1   :  { %v344_v2 = vadd.f32 %v343_v18, %v294_v17 }
  0xc2   :  { %v326_v20 = vpop.f32.mrf.mxu1 }
  0xc3   :  { %v327_v22 = vadd.f32 %v326_v20, %v277_v19 }
  0xc5   :  { %v356_v29 = vmax.f32 %v317_v24, %v327_v22 }
  0xc6   :  { %v297_v21 = vpop.f32.mrf.mxu2 }
  0xc8   :  { %v346_v23 = vpop.f32.mrf.mxu3  ;;  %v279_v27 = vpop.f32.mrf.mxu0 }
  0xc9   :  { %v347_v26 = vadd.f32 %v346_v23, %v297_v21 }
  0xca   :  { %v328_v28 = vpop.f32.mrf.mxu1 }
  0xcb   :  { %v360_v30 = vmax.f32 %v337_v25, %v347_v26  ;;  %v329_v35 = vadd.f32 %v328_v28, %v279_v27 }
  0xcd   :  { %v364_v32 = vmax.f32 %v356_v29, %v360_v30  ;;  %v357_v43 = vmax.f32 %v319_v37, %v329_v35 }
  0xce   :  { %v299_v33 = vpop.f32.mrf.mxu2 }
  0xcf   :  { %v372_v34 = vadd.f32 %v577_v31, %v364_v32 }
  0xd0   :  { %v348_v36 = vpop.f32.mrf.mxu3  ;;  %v282_v45 = vpop.f32.mrf.mxu0 }
  0xd1   :  { %v376_v39 = vmax.f32 %v372_v34, 0.0  ;;  %v349_v40 = vadd.f32 %v348_v36, %v299_v33 }
  0xd2   :  { %v331_v41 = vpop.f32.mrf.mxu1 }
  0xd3   :  { %v380_v42 = vpack.c.bf16 %v376_v39, %v376_v39  ;;  %v361_v44 = vmax.f32 %v339_v38, %v349_v40  ;;  %v332_v49 = vadd.f32 %v331_v41, %v282_v45 }
  0xd5   :  { %385 = vst.msk [vmem:[%s775_s3] sm:$0xf] %vm384_vm2, %v380_v42  ;;  %v365_v46 = vmax.f32 %v357_v43, %v361_v44  ;;  %v358_v56 = vmax.f32 %v322_v51, %v332_v49 }
  0xd6   :  { %v302_v47 = vpop.f32.mrf.mxu2 }
  0xd7   :  { %v373_v48 = vadd.f32 %v577_v31, %v365_v46 }
  0xd8   :  { %v351_v50 = vpop.f32.mrf.mxu3  ;;  %v284_v60 = vpop.f32.mrf.mxu0 }
  0xd9   :  { %v377_v53 = vmax.f32 %v373_v48, 0.0  ;;  %v352_v54 = vadd.f32 %v351_v50, %v302_v47 }
  0xda   :  { %v333_v58 = vpop.f32.mrf.mxu1 }
  0xdb   :  { %v381_v55 = vpack.c.bf16 %v377_v53, %v377_v53  ;;  %v362_v57 = vmax.f32 %v342_v52, %v352_v54  ;;  %v334_v62 = vadd.f32 %v333_v58, %v284_v60 }
  0xdd   :  { %386 = vst.msk [vmem:[%s775_s3 + $0x4] sm:$0xf] %vm384_vm2, %v381_v55  ;;  %v366_v59 = vmax.f32 %v358_v56, %v362_v57  ;;  %v359_v6 = vmax.f32 %v324_v1, %v334_v62 }
  0xde   :  { %v304_v63 = vpop.f32.mrf.mxu2 }
  0xdf   :  { %v374_v61 = vadd.f32 %v577_v31, %v366_v59 }
  0xe0   :  { %v353_v0 = vpop.f32.mrf.mxu3 }
  0xe1   :  { %v378_v3 = vmax.f32 %v374_v61, 0.0  ;;  %v354_v4 = vadd.f32 %v353_v0, %v304_v63 }
  0xe3   :  { %v382_v5 = vpack.c.bf16 %v378_v3, %v378_v3  ;;  %v363_v7 = vmax.f32 %v344_v2, %v354_v4 }
  0xe5   :  { %387 = vst.msk [vmem:[%s775_s3 + $0x8] sm:$0xf] %vm384_vm2, %v382_v5  ;;  %v367_v8 = vmax.f32 %v359_v6, %v363_v7 }
  0xe7   :  { %v375_v9 = vadd.f32 %v577_v31, %v367_v8 }
  0xe9   :  { %v379_v10 = vmax.f32 %v375_v9, 0.0 }
  0xeb   :  { %v383_v11 = vpack.c.bf16 %v379_v10, %v379_v10 }
  0xed   :  { %388 = vst.msk [vmem:[%s775_s3 + $0xc] sm:$0xf] %vm384_vm2, %v383_v11 }

// kernel: dnn_forward.5
= control target key start
LH: loop header
LB: loop body
LE: loop exit
PB: predicated region body
PF: predicated region fallthrough
CT: control target
= control target key end

     0   :  { %s854_s0 = inlined_call_operand.vmem [shape: bf16[2,512], index: 0, kind: input, shape index: {}]   ;;  %s855_s1 = inlined_call_operand.vmem [shape: bf16[512,128], index: 1, kind: input, shape index: {}]   ;;  %s856_s2 = inlined_call_operand.vmem [shape: f32[1,128], index: 2, kind: input, shape index: {}]   ;;  %s857_s3 = inlined_call_operand.vmem [shape: bf16[128,128], index: 3, kind: input, shape index: {}]   ;;  %s858_s4 = inlined_call_operand.vmem [shape: f32[1,128], index: 4, kind: input, shape index: {}]   ;;  %s859_s5 = inlined_call_operand.hbm [shape: f32[2,128], index: 5, kind: output, shape index: {}]  }
   0x1   :  { %v625_v0 = vld [vmem:[%s855_s1 + $0x38] sm:$0xff]  ;;  %v624_v4 = vld [vmem:[%s855_s1 + $0x30] sm:$0xff]  ;;  %v623_v8 = vld [vmem:[%s855_s1 + $0x28] sm:$0xff] }
   0x2   :  { %v633_v1 = vld [vmem:[%s855_s1 + $0x78] sm:$0xff]  ;;  %292 = vmatpush.bf16.msra.mxu0 %v625_v0  ;;  %v632_v5 = vld [vmem:[%s855_s1 + $0x70] sm:$0xff]  ;;  %v631_v9 = vld [vmem:[%s855_s1 + $0x68] sm:$0xff] }
   0x3   :  { %v641_v2 = vld [vmem:[%s855_s1 + $0xb8] sm:$0xff]  ;;  %305 = vmatpush.bf16.msra.mxu1 %v633_v1  ;;  %v640_v6 = vld [vmem:[%s855_s1 + $0xb0] sm:$0xff]  ;;  %v639_v10 = vld [vmem:[%s855_s1 + $0xa8] sm:$0xff] }
   0x4   :  { %v649_v3 = vld [vmem:[%s855_s1 + $0xf8] sm:$0xff]  ;;  %318 = vmatpush.bf16.msra.mxu2 %v641_v2  ;;  %v648_v7 = vld [vmem:[%s855_s1 + $0xf0] sm:$0xff]  ;;  %v647_v11 = vld [vmem:[%s855_s1 + $0xe8] sm:$0xff] }
   0x5   :  { %331 = vmatpush.bf16.msra.mxu3 %v649_v3  ;;  %v622_v12 = vld [vmem:[%s855_s1 + $0x20] sm:$0xff] }
   0x6   :  { %293 = vmatpush.bf16.msra.mxu0 %v624_v4  ;;  %v630_v13 = vld [vmem:[%s855_s1 + $0x60] sm:$0xff] }
   0x7   :  { %306 = vmatpush.bf16.msra.mxu1 %v632_v5  ;;  %v21_v14 = vld [vmem:[%s854_s0] sm:$0xf] }
   0x8   :  { %319 = vmatpush.bf16.msra.mxu2 %v640_v6  ;;  %v638_v15 = vld [vmem:[%s855_s1 + $0xa0] sm:$0xff]  ;;  %91 = vst [vmem:[#allocation1] ss:$9 sm:$0xff] %v21_v14 }
   0x9   :  { %332 = vmatpush.bf16.msra.mxu3 %v648_v7  ;;  %v646_v16 = vld [vmem:[%s855_s1 + $0xe0] sm:$0xff] }
   0xa   :  { %294 = vmatpush.bf16.msra.mxu0 %v623_v8 }
   0xb   :  { %307 = vmatpush.bf16.msra.mxu1 %v631_v9 }
   0xc   :  { %320 = vmatpush.bf16.msra.mxu2 %v639_v10 }
   0xd   :  { %333 = vmatpush.bf16.msra.mxu3 %v647_v11 }
   0xe   :  { %10 = vsyncpa [#allocation3], 0  ;;  %295 = vmatpush.bf16.msra.mxu0 %v622_v12  ;;  %v621_v17 = vld [vmem:[%s855_s1 + $0x18] sm:$0xff]  ;;  %v620_v21 = vld [vmem:[%s855_s1 + $0x10] sm:$0xff]  ;;  %vm427_vm0 = vcmask 1041408   ;;  %s449_s27 = sshll.u32 %s859_s5, 4  ;;  %s450_s27 = int_to_ptr.hbm [resolvable:$true] %s449_s27 }
   0xf   :  { %308 = vmatpush.bf16.msra.mxu1 %v630_v13  ;;  %v629_v18 = vld [vmem:[%s855_s1 + $0x58] sm:$0xff]  ;;  %v628_v22 = vld [vmem:[%s855_s1 + $0x50] sm:$0xff]  ;;  %v619_v25 = vld [vmem:[%s855_s1 + $0x8] sm:$0xff] }
  0x10   :  { %321 = vmatpush.bf16.msra.mxu2 %v638_v15  ;;  %v637_v19 = vld [vmem:[%s855_s1 + $0x98] sm:$0xff]  ;;  %v636_v23 = vld [vmem:[%s855_s1 + $0x90] sm:$0xff]  ;;  %v627_v26 = vld [vmem:[%s855_s1 + $0x48] sm:$0xff] }
  0x11   :  { %334 = vmatpush.bf16.msra.mxu3 %v646_v16  ;;  %v645_v20 = vld [vmem:[%s855_s1 + $0xd8] sm:$0xff]  ;;  %v644_v24 = vld [vmem:[%s855_s1 + $0xd0] sm:$0xff]  ;;  %v635_v27 = vld [vmem:[%s855_s1 + $0x88] sm:$0xff] }
  0x12   :  { %296 = vmatpush.bf16.msra.mxu0 %v621_v17  ;;  %v643_v28 = vld [vmem:[%s855_s1 + $0xc8] sm:$0xff]  ;;  %v618_v29 = vld [vmem:[%s855_s1] sm:$0xff]  ;;  %v657_v33 = vld [vmem:[%s857_s3 + $0x38] sm:$0xff] }
  0x13   :  { %309 = vmatpush.bf16.msra.mxu1 %v629_v18  ;;  %v626_v30 = vld [vmem:[%s855_s1 + $0x40] sm:$0xff]  ;;  %v93_v35 = vld [vmem:[#allocation1 + $0x9] sm:$0xff]  ;;  %v94_v36 = vld [vmem:[#allocation1 + $0x12] sm:$0xff] }
  0x14   :  { %322 = vmatpush.bf16.msra.mxu2 %v637_v19  ;;  %v634_v31 = vld [vmem:[%s855_s1 + $0x80] sm:$0xff]  ;;  %v656_v38 = vld [vmem:[%s857_s3 + $0x30] sm:$0xff]  ;;  %v655_v39 = vld [vmem:[%s857_s3 + $0x28] sm:$0xff] }
  0x15   :  { %335 = vmatpush.bf16.msra.mxu3 %v645_v20  ;;  %v642_v32 = vld [vmem:[%s855_s1 + $0xc0] sm:$0xff]  ;;  %v653_v41 = vld [vmem:[%s857_s3 + $0x18] sm:$0xff]  ;;  %v652_v42 = vld [vmem:[%s857_s3 + $0x10] sm:$0xff] }
  0x16   :  { %297 = vmatpush.bf16.msra.mxu0 %v620_v21  ;;  %v92_v34 = vld [vmem:[#allocation1] sm:$0xff]  ;;  %v651_v43 = vld [vmem:[%s857_s3 + $0x8] sm:$0xff] }
  0x17   :  { %310 = vmatpush.bf16.msra.mxu1 %v628_v22  ;;  %v95_v37 = vld [vmem:[#allocation1 + $0x1b] sm:$0xff] }
  0x18   :  { %323 = vmatpush.bf16.msra.mxu2 %v636_v23  ;;  %v654_v40 = vld [vmem:[%s857_s3 + $0x20] sm:$0xff] }
  0x19   :  { %336 = vmatpush.bf16.msra.mxu3 %v644_v24  ;;  %v650_v44 = vld [vmem:[%s857_s3] sm:$0xff] }
  0x1a   :  { %298 = vmatpush.bf16.msra.mxu0 %v619_v25  ;;  %v659_v45 = vld [vmem:[%s856_s2] ss:$0 sm:$0xff]  ;;  %s691_s2 = smov [#allocation2]  }
  0x1b   :  { %311 = vmatpush.bf16.msra.mxu1 %v627_v26  ;;  %v660_v60 = vld [vmem:[%s858_s4] ss:$0 sm:$0xff]  ;;  %s447_s25 = sshll.u32 %s691_s2, 4  ;;  %s448_s25 = int_to_ptr.vmem [resolvable:$true] %s447_s25 }
  0x1c   :  { %324 = vmatpush.bf16.msra.mxu2 %v635_v27 }
  0x1d   :  { %337 = vmatpush.bf16.msra.mxu3 %v643_v28 }
  0x1e   :  { %299 = vmatpush.bf16.msra.mxu0 %v618_v29 }
  0x1f   :  { %312 = vmatpush.bf16.msra.mxu1 %v626_v30 }
  0x20   :  { %325 = vmatpush.bf16.msra.mxu2 %v634_v31 }
  0x21   :  { %338 = vmatpush.bf16.msra.mxu3 %v642_v32  ;;  %300 = vmatmul.bf16.vlgmr.msra.gmra.mxu0 %v92_v34 }
  0x22   :  { %414 = vmatpush.bf16.msrb.mxu0 %v657_v33  ;;  %313 = vmatmul.bf16.vlgmr.msra.gmra.mxu1 %v93_v35 }
  0x23   :  { %326 = vmatmul.bf16.vlgmr.msra.gmra.mxu2 %v94_v36 }
  0x24   :  { %339 = vmatmul.bf16.vlgmr.msra.gmra.mxu3 %v95_v37 }
  0x26   :  { %415 = vmatpush.bf16.msrb.mxu0 %v656_v38 }
  0x2a   :  { %416 = vmatpush.bf16.msrb.mxu0 %v655_v39 }
  0x2e   :  { %417 = vmatpush.bf16.msrb.mxu0 %v654_v40 }
  0x32   :  { %418 = vmatpush.bf16.msrb.mxu0 %v653_v41 }
  0x36   :  { %419 = vmatpush.bf16.msrb.mxu0 %v652_v42 }
  0x3a   :  { %420 = vmatpush.bf16.msrb.mxu0 %v651_v43 }
  0x3e   :  { %421 = vmatpush.bf16.msrb.mxu0 %v650_v44 }
  0x9e   :  { %v301_v46 = vpop.f32.mrf.mxu0 }
  0x9f   :  { %v314_v47 = vpop.f32.mrf.mxu1  ;;  %v302_v48 = vadd.f32 %v659_v45, %v301_v46 }
  0xa1   :  { %v315_v49 = vadd.f32 %v314_v47, %v302_v48 }
  0xa6   :  { %v327_v50 = vpop.f32.mrf.mxu2  ;;  %v303_v53 = vpop.f32.mrf.mxu0 }
  0xa7   :  { %v340_v51 = vpop.f32.mrf.mxu3  ;;  %v328_v52 = vadd.f32 %v327_v50, %v315_v49  ;;  %v316_v54 = vpop.f32.mrf.mxu1 }
  0xa9   :  { %v341_v55 = vadd.f32 %v340_v51, %v328_v52 }
  0xab   :  { %v344_v56 = vmax.f32 %v341_v55, 0.0 }
  0xad   :  { %v345_v57 = vpack.c.bf16 %v344_v56, %v344_v56 }
  0xae   :  { %v329_v58 = vpop.f32.mrf.mxu2 }
  0xaf   :  { %v342_v59 = vpop.f32.mrf.mxu3  ;;  %422 = vmatmul.bf16.vlgmr.msrb.gmra.mxu0 %v345_v57 }
 0x12c   :  { %v423_v61 = vpop.f32.mrf.mxu0 }
 0x12d   :  { %v424_v62 = vadd.f32 %v660_v60, %v423_v61 }
 0x12f   :  { %v428_v63 = vsel %vm427_vm0, %v424_v62, -inf }
 0x130   :  { %429 = vmax.xlane.f32.xlu0 %v428_v63 }
 0x134   :  { %v425_v0 = vpop.f32.mrf.mxu0 }
 0x1a3   :  { %v430_v1 = vpop.xlane.xlu0 %429 }
 0x1a4   :  { %v431_v2 = vsub.f32 %v424_v62, %v430_v1 }
 0x1a6   :  { %v432_v3 = vmul.f32 1.442695, %v431_v2 }
 0x1a8   :  { %661 = vpow2.f32 %v432_v3 }
 0x1ae   :  { %v662_v4 = vpop.eup %661 }
 0x1af   :  { %v434_v5 = vsel %vm427_vm0, %v662_v4, 0.0 }
 0x1b0   :  { %435 = vadd.xlane.f32.xlu0 %v434_v5 }
 0x223   :  { %v436_v6 = vpop.xlane.xlu0 %435 }
 0x224   :  { %663 = vlog2.f32 %v436_v6 }
 0x22a   :  { %v664_v7 = vpop.eup %663 }
 0x22b   :  { %v438_v8 = vmul.f32 0.6931472, %v664_v7 }
 0x22d   :  { %v439_v9 = vadd.f32 %v438_v8, %v430_v1 }
 0x22f   :  { %v440_v10 = vsub.f32 %v424_v62, %v439_v9 }
 0x231   :  { %441 = vst [vmem:[#allocation2] sm:$0x3] %v440_v10 }
 0x232   :  { %452 = dma.vmem_to_hbm [thread:$0]  %s448_s25, 32, %s450_s27, [#allocation3]  }
 0x233   :  { %689 = dma.done.wait [#allocation3], 32  }
 0x234   :  { %690 = vsyncadd [#allocation3], 4294967264 }
 0x235   :  { %457 = vsyncpa [#allocation3], 1 }

</bundles_post_ra>
